<compile_context>
chip_gen: v5e
topology: v5e:2x2
jax: 0.10.0
libtpu: 0.0.40
codegen_flags: <defaults>
</compile_context>

<pallas_src>
import math

import jax
import jax.numpy as jnp
from jax.experimental import pallas as pl
from jax.experimental.pallas import tpu as pltpu

# ---------------- scaled-down configuration (original values in comments) ----
B = 2
H_IN, W_IN = 33, 140            # original EEG input: (129, 500)
KW, CONV_PAD = 36, 2            # conv1 kernel/stride (1, 36), padding (0, 2)
C1 = 32                         # original: 256 conv1 output channels
D = 3 * C1                      # hidden size (original: 768 = 3 * 256)
NH = 4                          # original: 12 heads
HD = D // NH
FF = 4 * D                      # original: 3072
L = 2                           # original: 12 encoder layers
LN_EPS = 1e-12                  # HF ViT layer_norm_eps
BN_EPS = 0.0                    # nn.BatchNorm2d(256, False) -> eps=False == 0.0 quirk
NUM_CLASSES = 2
PUP_H = 64                      # pupil head hidden (original: 1000)
POS_H1, POS_H2 = 128, 64        # position head hiddens (original: 2048, 1000)

W_OUT = (W_IN + 2 * CONV_PAD - KW) // KW + 1   # conv1 output width (orig: 14)
NUM_PATCHES = W_OUT                            # patch kernel (H_IN, 1) -> one patch row
S = NUM_PATCHES + 1                            # +CLS token

# bf16 operands into the MXU (f32 accumulation).  Set to jnp.float32 for
# bit-faithful f32 matmuls.
MXU_DTYPE = jnp.bfloat16


# ------------------------------ BlockSpec helpers -----------------------------
def _const_spec(shape):
    """Whole-array block, same block every grid step (fetched once, stays resident)."""
    nd = len(shape)
    return pl.BlockSpec(tuple(shape), lambda l, _n=nd: (0,) * _n)


def _layer_spec(shape):
    """Per-layer weight: leading axis is the layer index, streamed (double-buffered)."""
    nd = len(shape)
    return pl.BlockSpec((1,) + tuple(shape[1:]),
                        lambda l, _n=nd: (l,) + (0,) * (_n - 1))


# ------------------------------ the fused kernel -------------------------------
def _vit_fused_kernel(
        patches_ref, wemb_ref, bemb_ref, clspos_ref,                 # preamble (const)
        ln_ref, wqkv_ref, bqkv_ref, wo_ref, bo_ref,                  # per-layer
        w1_ref, b1_ref, w2_ref, b2_ref,                              # per-layer
        pw1_ref, pb1_ref, pw2_ref, pb2_ref,                          # pupil head (const)
        qw1a_ref, qw1b_ref, qb1_ref, qw2_ref, qb2_ref, qw3_ref, qb3_ref,  # pos head (const)
        pos_ref, pup_ref, shared_ref,                                # outputs
        h_ref):                                                      # VMEM scratch (B*S, D)
    l = pl.program_id(0)

    def mm(a, w):
        # bf16 MXU operands, f32 accumulation; each activation feeds exactly one mm,
        # so the cast happens once per tensor per layer.
        return jnp.dot(a.astype(MXU_DTYPE), w.astype(MXU_DTYPE),
                       preferred_element_type=jnp.float32)

    def layernorm(x, g, b):
        mu = jnp.mean(x, axis=-1, keepdims=True)
        var = jnp.mean(jnp.square(x - mu), axis=-1, keepdims=True)
        return (x - mu) * jax.lax.rsqrt(var + LN_EPS) * g + b

    # ---- step 0 preamble: conv1+BN+grouped patch-embed as ONE matmul, CLS/pos-add
    @pl.when(l == 0)
    def _():
        emb = mm(patches_ref[...], wemb_ref[...]) + bemb_ref[...]    # (B*W_OUT, D)
        clspos = clspos_ref[...]                                     # (S, D): row0 = cls+pos0
        rows = []
        for b in range(B):
            rows.append(clspos[0:1])                                 # CLS token row
            rows.append(emb[b * W_OUT:(b + 1) * W_OUT] + clspos[1:S])
        h_ref[...] = jnp.concatenate(rows, axis=0)                   # (B*S, D) f32

    # ---- one encoder layer; batch folded into M = B*S for all token matmuls ----
    g1, be1 = ln_ref[0, 0], ln_ref[0, 1]
    g2, be2 = ln_ref[0, 2], ln_ref[0, 3]
    x0 = h_ref[...]                                                  # (B*S, D) f32
    xn = layernorm(x0, g1, be1)
    qkv = mm(xn, wqkv_ref[0]) + bqkv_ref[0]                          # (B*S, 3D) lane-dense QKV

    scale = 1.0 / math.sqrt(HD)
    ctx_rows = []
    for b in range(B):                                               # tiny static unroll
        heads = []
        for hh in range(NH):
            qh = qkv[b * S:(b + 1) * S, 0 * D + hh * HD: 0 * D + (hh + 1) * HD]
            kh = qkv[b * S:(b + 1) * S, 1 * D + hh * HD: 1 * D + (hh + 1) * HD]
            vh = qkv[b * S:(b + 1) * S, 2 * D + hh * HD: 2 * D + (hh + 1) * HD]
            s = jax.lax.dot_general(qh.astype(MXU_DTYPE), kh.astype(MXU_DTYPE),
                                    (((1,), (1,)), ((), ())),
                                    preferred_element_type=jnp.float32) * scale   # (S, S)
            s = s - jnp.max(s, axis=-1, keepdims=True)
            e = jnp.exp(s)
            p = e * pl.reciprocal(jnp.sum(e, axis=-1, keepdims=True), approx=True)
            heads.append(mm(p, vh))                                  # (S, HD)
        ctx_rows.append(jnp.concatenate(heads, axis=-1))             # heads along lanes -> (S, D)
    ctx = jnp.concatenate(ctx_rows, axis=0)                          # (B*S, D)
    x1 = x0 + mm(ctx, wo_ref[0]) + bo_ref[0]                         # single (M,D)@(D,D) out-proj

    xn2 = layernorm(x1, g2, be2)
    # TODO(synk): HF ViT uses exact (erf) GELU; tanh approximation kept for Mosaic
    # portability (~1e-3 deviation).
    mid = jax.nn.gelu(mm(xn2, w1_ref[0]) + b1_ref[0], approximate=True)   # (B*S, FF)
    x2 = x1 + mm(mid, w2_ref[0]) + b2_ref[0]
    h_ref[...] = x2

    # ---- last step: shared CLS features + both prediction heads, fused in-kernel ----
    @pl.when(l == pl.num_programs(0) - 1)
    def _():
        shared = jnp.concatenate([x2[b * S:b * S + 1] for b in range(B)], axis=0)  # (B, D)
        shared_ref[...] = shared
        # pupil_size_predictor: Linear -> Dropout(identity) -> Linear (N=1 via VPU dot)
        pm = mm(shared, pw1_ref[...]) + pb1_ref[...]                                # (B, PUP_H)
        pup = jnp.sum(pm * pw2_ref[...], axis=-1, keepdims=True) + pb2_ref[...]     # (B, 1)
        # position_predictor on cat(shared, pupil):
        #   cat(s, p) @ W1 == s @ W1[:D] + p * W1[D]   (no lane concat needed)
        h1 = mm(shared, qw1a_ref[...]) + pup * qw1b_ref[...] + qb1_ref[...]         # (B, POS_H1)
        h2 = mm(h1, qw2_ref[...]) + qb2_ref[...]                                    # (B, POS_H2)
        pos_ref[...] = mm(h2, qw3_ref[...]) + qb3_ref[...]                          # (B, 2)
        pup_ref[...] = pup


# ------------------------------ parameter init --------------------------------
def init_params(key):
    keys = iter(jax.random.split(key, 48))
    nk = lambda: next(keys)

    def nrm(shape, scale=0.02):
        return scale * jax.random.normal(nk(), shape, jnp.float32)

    # ---- raw PyTorch-layout parameters (what a real checkpoint would supply) ----
    conv1_w = nrm((C1, 1, 1, KW), 0.1)            # Conv2d(1, C1, (1, KW), bias=False)
    bn_gamma = 1.0 + nrm((C1,))
    bn_beta = nrm((C1,))
    bn_mean = nrm((C1,))
    bn_var = 1.0 + 0.1 * jnp.abs(jax.random.normal(nk(), (C1,), jnp.float32))
    patch_w = nrm((3 * C1, 1, H_IN, 1), 0.1)      # grouped Conv2d(C1, 3*C1, (H,1), groups=C1)
    patch_b = nrm((3 * C1,))
    cls_token = nrm((1, 1, D))
    pos_emb = nrm((1, S, D))

    # ---- fold conv1 + BN(running stats, eps=0 quirk) + grouped patch conv into ONE
    #      (H*KW, D) matmul weight; restructuring done ONCE here, never per forward.
    bn_scale = bn_gamma * jax.lax.rsqrt(bn_var + BN_EPS)
    bn_shift = bn_beta - bn_mean * bn_scale
    pw = patch_w.reshape(C1, 3, H_IN)                        # [group g, out j, h]
    cw = conv1_w.reshape(C1, KW) * bn_scale[:, None]         # [g, kw] with BN scale folded
    w_embed = jnp.einsum("gjh,gk->hkgj", pw, cw).reshape(H_IN * KW, D)   # rows (h,kw), cols 3g+j
    b_embed = (patch_b + jnp.einsum("gjh,g->gj", pw, bn_shift).reshape(D)).reshape(1, D)
    cls_pos = pos_emb[0].at[0].add(cls_token[0, 0])          # (S, D): row0 = cls + pos[0]

    p = {
        "w_embed": w_embed.astype(MXU_DTYPE),
        "b_embed": b_embed,
        "cls_pos": cls_pos,
        "enc": {
            "ln": jnp.concatenate([1.0 + nrm((L, 1, 1, D)), nrm((L, 1, 1, D)),
                                   1.0 + nrm((L, 1, 1, D)), nrm((L, 1, 1, D))],
                                  axis=1),                   # (L, 4, 1, D): ln1_g|ln1_b|ln2_g|ln2_b
            "wqkv": nrm((L, D, 3 * D)).astype(MXU_DTYPE),    # fused [Wq | Wk | Wv] along lanes
            "bqkv": nrm((L, 1, 3 * D)),
            "wo": nrm((L, D, D)).astype(MXU_DTYPE),
            "bo": nrm((L, 1, D)),
            "w1": nrm((L, D, FF)).astype(MXU_DTYPE), "b1": nrm((L, 1, FF)),
            "w2": nrm((L, FF, D)).astype(MXU_DTYPE), "b2": nrm((L, 1, D)),
        },
        # pupil_size_predictor: Linear(D, PUP_H) -> Dropout -> Linear(PUP_H, 1)
        "pup_w1": nrm((D, PUP_H)).astype(MXU_DTYPE),
        "pup_b1": nrm((PUP_H,)).reshape(1, PUP_H),
        "pup_w2": nrm((PUP_H,)).reshape(1, PUP_H),           # Linear(PUP_H,1).weight as a row
        "pup_b2": nrm((1,)).reshape(1, 1),
    }
    # position_predictor: Linear(D+1, POS_H1) -> Linear(POS_H1, POS_H2) -> Linear(POS_H2, 2)
    pos_w1 = nrm((D + 1, POS_H1))
    p.update({
        "pos_w1a": pos_w1[:D].astype(MXU_DTYPE),
        "pos_w1b": pos_w1[D:D + 1],                          # the pupil-size row
        "pos_b1": nrm((POS_H1,)).reshape(1, POS_H1),
        "pos_w2": nrm((POS_H1, POS_H2)).astype(MXU_DTYPE),
        "pos_b2": nrm((POS_H2,)).reshape(1, POS_H2),
        "pos_w3": nrm((POS_H2, NUM_CLASSES)).astype(MXU_DTYPE),
        "pos_b3": nrm((NUM_CLASSES,)).reshape(1, NUM_CLASSES),
    })
    return p


# --------------------------------- forward ------------------------------------
def forward(x, p):
    assert x.shape == (B, 1, H_IN, W_IN)
    # im2col for conv1 (stride == kernel width, pad 2): tiny XLA glue, rows (b,w), cols (h,kw)
    xp = jnp.pad(x[:, 0], ((0, 0), (0, 0), (CONV_PAD, CONV_PAD)))     # (B, H, W+2*pad)
    assert xp.shape[-1] == W_OUT * KW
    patches = (xp.reshape(B, H_IN, W_OUT, KW)
                 .transpose(0, 2, 1, 3)
                 .reshape(B * W_OUT, H_IN * KW))

    e = p["enc"]
    const_in = [patches, p["w_embed"], p["b_embed"], p["cls_pos"]]
    layer_in = [e["ln"], e["wqkv"], e["bqkv"], e["wo"], e["bo"],
                e["w1"], e["b1"], e["w2"], e["b2"]]
    head_in = [p["pup_w1"], p["pup_b1"], p["pup_w2"], p["pup_b2"],
               p["pos_w1a"], p["pos_w1b"], p["pos_b1"],
               p["pos_w2"], p["pos_b2"], p["pos_w3"], p["pos_b3"]]

    in_specs = ([_const_spec(a.shape) for a in const_in]
                + [_layer_spec(a.shape) for a in layer_in]
                + [_const_spec(a.shape) for a in head_in])

    out_shape = (jax.ShapeDtypeStruct((B, NUM_CLASSES), jnp.float32),
                 jax.ShapeDtypeStruct((B, 1), jnp.float32),
                 jax.ShapeDtypeStruct((B, D), jnp.float32))
    out_specs = (_const_spec((B, NUM_CLASSES)),
                 _const_spec((B, 1)),
                 _const_spec((B, D)))

    positions, pupil_size, shared = pl.pallas_call(
        _vit_fused_kernel,
        out_shape=out_shape,
        grid=(L,),
        in_specs=in_specs,
        out_specs=out_specs,
        scratch_shapes=[pltpu.VMEM((B * S, D), jnp.float32)],         # hidden state carry
        compiler_params=pltpu.CompilerParams(
            dimension_semantics=("arbitrary",),                       # h carried layer-to-layer
            vmem_limit_bytes=64 * 1024 * 1024),
    )(*const_in, *layer_in, *head_in)
    return positions, pupil_size, shared


if __name__ == "__main__":
    root = jax.random.PRNGKey(0)
    k_x, k_p = jax.random.split(root)
    x = jax.random.normal(k_x, (B, 1, H_IN, W_IN), jnp.float32)
    params = init_params(k_p)

    fwd = jax.jit(forward)
    positions, pupil_size, shared = fwd(x, params)
    jax.block_until_ready((positions, pupil_size, shared))

    assert positions.shape == (B, NUM_CLASSES)
    assert pupil_size.shape == (B, 1)
    assert shared.shape == (B, D)
    for t in (positions, pupil_size, shared):
        assert t.dtype == jnp.float32
        assert bool(jnp.all(jnp.isfinite(t)))
    print("KERNEL_OK")
</pallas_src>

<mosaic_0001>
module attributes {stable_mosaic.version = 11 : i64} {
  func.func @_vit_fused_kernel(%arg0: i32, %arg1: memref<8x1188xf32, #tpu.memory_space<vmem>>, %arg2: memref<1188x96xbf16, #tpu.memory_space<vmem>>, %arg3: memref<1x96xf32, #tpu.memory_space<vmem>>, %arg4: memref<5x96xf32, #tpu.memory_space<vmem>>, %arg5: memref<1x4x1x96xf32, #tpu.memory_space<vmem>>, %arg6: memref<1x96x288xbf16, #tpu.memory_space<vmem>>, %arg7: memref<1x1x288xf32, #tpu.memory_space<vmem>>, %arg8: memref<1x96x96xbf16, #tpu.memory_space<vmem>>, %arg9: memref<1x1x96xf32, #tpu.memory_space<vmem>>, %arg10: memref<1x96x384xbf16, #tpu.memory_space<vmem>>, %arg11: memref<1x1x384xf32, #tpu.memory_space<vmem>>, %arg12: memref<1x384x96xbf16, #tpu.memory_space<vmem>>, %arg13: memref<1x1x96xf32, #tpu.memory_space<vmem>>, %arg14: memref<96x64xbf16, #tpu.memory_space<vmem>>, %arg15: memref<1x64xf32, #tpu.memory_space<vmem>>, %arg16: memref<1x64xf32, #tpu.memory_space<vmem>>, %arg17: memref<1x1xf32, #tpu.memory_space<vmem>>, %arg18: memref<96x128xbf16, #tpu.memory_space<vmem>>, %arg19: memref<1x128xf32, #tpu.memory_space<vmem>>, %arg20: memref<1x128xf32, #tpu.memory_space<vmem>>, %arg21: memref<128x64xbf16, #tpu.memory_space<vmem>>, %arg22: memref<1x64xf32, #tpu.memory_space<vmem>>, %arg23: memref<64x2xbf16, #tpu.memory_space<vmem>>, %arg24: memref<1x2xf32, #tpu.memory_space<vmem>>, %arg25: memref<2x2xf32, #tpu.memory_space<vmem>>, %arg26: memref<2x1xf32, #tpu.memory_space<vmem>>, %arg27: memref<2x96xf32, #tpu.memory_space<vmem>>, %arg28: memref<10x96xf32, #tpu.memory_space<vmem>>) attributes {dimension_semantics = [#tpu.dimension_semantics<arbitrary>], iteration_bounds = array<i64: 2>, scalar_prefetch = 0 : i64, scratch_operands = 1 : i64, tpu.core_type = #tpu.core_type<tc>, window_params = [{pipeline_mode = #tpu.pipeline_mode<synchronous>, transform_indices = @transform_0, window_bounds = array<i64: 8, 1188>}, {pipeline_mode = #tpu.pipeline_mode<synchronous>, transform_indices = @transform_1, window_bounds = array<i64: 1188, 96>}, {pipeline_mode = #tpu.pipeline_mode<synchronous>, transform_indices = @transform_2, window_bounds = array<i64: 1, 96>}, {pipeline_mode = #tpu.pipeline_mode<synchronous>, transform_indices = @transform_3, window_bounds = array<i64: 5, 96>}, {transform_indices = @transform_4, window_bounds = array<i64: 1, 4, 1, 96>}, {transform_indices = @transform_5, window_bounds = array<i64: 1, 96, 288>}, {transform_indices = @transform_6, window_bounds = array<i64: 1, 1, 288>}, {transform_indices = @transform_7, window_bounds = array<i64: 1, 96, 96>}, {transform_indices = @transform_8, window_bounds = array<i64: 1, 1, 96>}, {transform_indices = @transform_9, window_bounds = array<i64: 1, 96, 384>}, {transform_indices = @transform_10, window_bounds = array<i64: 1, 1, 384>}, {transform_indices = @transform_11, window_bounds = array<i64: 1, 384, 96>}, {transform_indices = @transform_12, window_bounds = array<i64: 1, 1, 96>}, {pipeline_mode = #tpu.pipeline_mode<synchronous>, transform_indices = @transform_13, window_bounds = array<i64: 96, 64>}, {pipeline_mode = #tpu.pipeline_mode<synchronous>, transform_indices = @transform_14, window_bounds = array<i64: 1, 64>}, {pipeline_mode = #tpu.pipeline_mode<synchronous>, transform_indices = @transform_15, window_bounds = array<i64: 1, 64>}, {pipeline_mode = #tpu.pipeline_mode<synchronous>, transform_indices = @transform_16, window_bounds = array<i64: 1, 1>}, {pipeline_mode = #tpu.pipeline_mode<synchronous>, transform_indices = @transform_17, window_bounds = array<i64: 96, 128>}, {pipeline_mode = #tpu.pipeline_mode<synchronous>, transform_indices = @transform_18, window_bounds = array<i64: 1, 128>}, {pipeline_mode = #tpu.pipeline_mode<synchronous>, transform_indices = @transform_19, window_bounds = array<i64: 1, 128>}, {pipeline_mode = #tpu.pipeline_mode<synchronous>, transform_indices = @transform_20, window_bounds = array<i64: 128, 64>}, {pipeline_mode = #tpu.pipeline_mode<synchronous>, transform_indices = @transform_21, window_bounds = array<i64: 1, 64>}, {pipeline_mode = #tpu.pipeline_mode<synchronous>, transform_indices = @transform_22, window_bounds = array<i64: 64, 2>}, {pipeline_mode = #tpu.pipeline_mode<synchronous>, transform_indices = @transform_23, window_bounds = array<i64: 1, 2>}, {pipeline_mode = #tpu.pipeline_mode<synchronous>, transform_indices = @transform_24, window_bounds = array<i64: 2, 2>}, {pipeline_mode = #tpu.pipeline_mode<synchronous>, transform_indices = @transform_25, window_bounds = array<i64: 2, 1>}, {pipeline_mode = #tpu.pipeline_mode<synchronous>, transform_indices = @transform_26, window_bounds = array<i64: 2, 96>}]} {
    %c0_i32 = arith.constant 0 : i32
    %0 = arith.cmpi eq, %arg0, %c0_i32 : i32
    %1 = arith.extui %0 : i1 to i32
    %c0_i32_0 = arith.constant 0 : i32
    %2 = arith.cmpi ne, %1, %c0_i32_0 : i32
    scf.if %2 {
      %c0_99 = arith.constant 0 : index
      %c0_100 = arith.constant 0 : index
      %278 = vector.load %arg1[%c0_99, %c0_100] : memref<8x1188xf32, #tpu.memory_space<vmem>>, vector<8x1188xf32>
      %c0_101 = arith.constant 0 : index
      %c0_102 = arith.constant 0 : index
      %279 = vector.load %arg2[%c0_101, %c0_102] : memref<1188x96xbf16, #tpu.memory_space<vmem>>, vector<1188x96xbf16>
      %280 = arith.truncf %278 : vector<8x1188xf32> to vector<8x1188xbf16>
      %cst_103 = arith.constant dense<0.000000e+00> : vector<8x96xf32>
      %281 = tpu.matmul %280, %279, %cst_103 {dimension_numbers = #tpu.dot_dimension_numbers<[1], [0], [0], [1], [0, 0, 1, 1], [], []>} : vector<8x1188xbf16>, vector<1188x96xbf16>, vector<8x96xf32> -> vector<8x96xf32>
      %c0_104 = arith.constant 0 : index
      %c0_105 = arith.constant 0 : index
      %282 = vector.load %arg3[%c0_104, %c0_105] : memref<1x96xf32, #tpu.memory_space<vmem>>, vector<1x96xf32>
      %283 = vector.broadcast %282 : vector<1x96xf32> to vector<8x96xf32>
      %284 = arith.addf %281, %283 : vector<8x96xf32>
      %c0_106 = arith.constant 0 : index
      %c0_107 = arith.constant 0 : index
      %285 = vector.load %arg4[%c0_106, %c0_107] : memref<5x96xf32, #tpu.memory_space<vmem>>, vector<5x96xf32>
      %286 = vector.extract_strided_slice %285 {offsets = [0, 0], sizes = [1, 96], strides = [1, 1]} : vector<5x96xf32> to vector<1x96xf32>
      %287 = vector.extract_strided_slice %284 {offsets = [0, 0], sizes = [4, 96], strides = [1, 1]} : vector<8x96xf32> to vector<4x96xf32>
      %288 = vector.extract_strided_slice %285 {offsets = [1, 0], sizes = [4, 96], strides = [1, 1]} : vector<5x96xf32> to vector<4x96xf32>
      %289 = arith.addf %287, %288 : vector<4x96xf32>
      %290 = vector.extract_strided_slice %285 {offsets = [0, 0], sizes = [1, 96], strides = [1, 1]} : vector<5x96xf32> to vector<1x96xf32>
      %291 = vector.extract_strided_slice %284 {offsets = [4, 0], sizes = [4, 96], strides = [1, 1]} : vector<8x96xf32> to vector<4x96xf32>
      %292 = vector.extract_strided_slice %285 {offsets = [1, 0], sizes = [4, 96], strides = [1, 1]} : vector<5x96xf32> to vector<4x96xf32>
      %293 = arith.addf %291, %292 : vector<4x96xf32>
      %294 = tpu.concatenate %286, %289, %290, %293 in 0 : vector<1x96xf32>, vector<4x96xf32>, vector<1x96xf32>, vector<4x96xf32> -> vector<10x96xf32>
      %c0_108 = arith.constant 0 : index
      %c0_109 = arith.constant 0 : index
      %295 = vector.load %arg28[%c0_108, %c0_109] : memref<10x96xf32, #tpu.memory_space<vmem>>, vector<10x96xf32>
      tpu.vector_store %arg28[%c0_108, %c0_109], %294 {strides = array<i32>} : memref<10x96xf32, #tpu.memory_space<vmem>>, vector<10x96xf32>,
    } else {
    }
    %c0 = arith.constant 0 : index
    %c0_1 = arith.constant 0 : index
    %c0_2 = arith.constant 0 : index
    %c0_3 = arith.constant 0 : index
    %3 = vector.load %arg5[%c0, %c0_1, %c0_2, %c0_3] : memref<1x4x1x96xf32, #tpu.memory_space<vmem>>, vector<1x1x1x96xf32>
    %4 = vector.shape_cast %3 : vector<1x1x1x96xf32> to vector<1x96xf32>
    %c0_4 = arith.constant 0 : index
    %c1 = arith.constant 1 : index
    %c0_5 = arith.constant 0 : index
    %c0_6 = arith.constant 0 : index
    %5 = vector.load %arg5[%c0_4, %c1, %c0_5, %c0_6] : memref<1x4x1x96xf32, #tpu.memory_space<vmem>>, vector<1x1x1x96xf32>
    %6 = vector.shape_cast %5 : vector<1x1x1x96xf32> to vector<1x96xf32>
    %c0_7 = arith.constant 0 : index
    %c2 = arith.constant 2 : index
    %c0_8 = arith.constant 0 : index
    %c0_9 = arith.constant 0 : index
    %7 = vector.load %arg5[%c0_7, %c2, %c0_8, %c0_9] : memref<1x4x1x96xf32, #tpu.memory_space<vmem>>, vector<1x1x1x96xf32>
    %8 = vector.shape_cast %7 : vector<1x1x1x96xf32> to vector<1x96xf32>
    %c0_10 = arith.constant 0 : index
    %c3 = arith.constant 3 : index
    %c0_11 = arith.constant 0 : index
    %c0_12 = arith.constant 0 : index
    %9 = vector.load %arg5[%c0_10, %c3, %c0_11, %c0_12] : memref<1x4x1x96xf32, #tpu.memory_space<vmem>>, vector<1x1x1x96xf32>
    %10 = vector.shape_cast %9 : vector<1x1x1x96xf32> to vector<1x96xf32>
    %c0_13 = arith.constant 0 : index
    %c0_14 = arith.constant 0 : index
    %11 = vector.load %arg28[%c0_13, %c0_14] : memref<10x96xf32, #tpu.memory_space<vmem>>, vector<10x96xf32>
    %cst = arith.constant dense<0.000000e+00> : vector<10xf32>
    %12 = vector.multi_reduction <add>, %11, %cst [1] : vector<10x96xf32> to vector<10xf32>
    %13 = vector.shape_cast %12 : vector<10xf32> to vector<10x1xf32>
    %cst_15 = arith.constant 9.600000e+01 : f32
    %14 = vector.broadcast %cst_15 : f32 to vector<10x1xf32>
    %15 = arith.divf %13, %14 : vector<10x1xf32>
    %16 = vector.broadcast %15 : vector<10x1xf32> to vector<10x96xf32>
    %17 = arith.subf %11, %16 : vector<10x96xf32>
    %18 = arith.mulf %17, %17 : vector<10x96xf32>
    %cst_16 = arith.constant dense<0.000000e+00> : vector<10xf32>
    %19 = vector.multi_reduction <add>, %18, %cst_16 [1] : vector<10x96xf32> to vector<10xf32>
    %20 = vector.shape_cast %19 : vector<10xf32> to vector<10x1xf32>
    %cst_17 = arith.constant 9.600000e+01 : f32
    %21 = vector.broadcast %cst_17 : f32 to vector<10x1xf32>
    %22 = arith.divf %20, %21 : vector<10x1xf32>
    %23 = vector.broadcast %15 : vector<10x1xf32> to vector<10x96xf32>
    %24 = arith.subf %11, %23 : vector<10x96xf32>
    %cst_18 = arith.constant 9.99999996E-13 : f32
    %25 = vector.broadcast %cst_18 : f32 to vector<10x1xf32>
    %26 = arith.addf %22, %25 : vector<10x1xf32>
    %27 = math.rsqrt %26 : vector<10x1xf32>
    %28 = vector.broadcast %27 : vector<10x1xf32> to vector<10x96xf32>
    %29 = arith.mulf %24, %28 : vector<10x96xf32>
    %30 = vector.broadcast %4 : vector<1x96xf32> to vector<10x96xf32>
    %31 = arith.mulf %29, %30 : vector<10x96xf32>
    %32 = vector.broadcast %6 : vector<1x96xf32> to vector<10x96xf32>
    %33 = arith.addf %31, %32 : vector<10x96xf32>
    %c0_19 = arith.constant 0 : index
    %c0_20 = arith.constant 0 : index
    %c0_21 = arith.constant 0 : index
    %34 = vector.load %arg6[%c0_19, %c0_20, %c0_21] : memref<1x96x288xbf16, #tpu.memory_space<vmem>>, vector<1x96x288xbf16>
    %35 = vector.shape_cast %34 : vector<1x96x288xbf16> to vector<96x288xbf16>
    %36 = arith.truncf %33 : vector<10x96xf32> to vector<10x96xbf16>
    %cst_22 = arith.constant dense<0.000000e+00> : vector<10x288xf32>
    %37 = tpu.matmul %36, %35, %cst_22 {dimension_numbers = #tpu.dot_dimension_numbers<[1], [0], [0], [1], [0, 0, 1, 1], [], []>} : vector<10x96xbf16>, vector<96x288xbf16>, vector<10x288xf32> -> vector<10x288xf32>
    %c0_23 = arith.constant 0 : index
    %c0_24 = arith.constant 0 : index
    %c0_25 = arith.constant 0 : index
    %38 = vector.load %arg7[%c0_23, %c0_24, %c0_25] : memref<1x1x288xf32, #tpu.memory_space<vmem>>, vector<1x1x288xf32>
    %39 = vector.shape_cast %38 : vector<1x1x288xf32> to vector<1x288xf32>
    %40 = vector.broadcast %39 : vector<1x288xf32> to vector<10x288xf32>
    %41 = arith.addf %37, %40 : vector<10x288xf32>
    %42 = vector.extract_strided_slice %41 {offsets = [0, 0], sizes = [5, 24], strides = [1, 1]} : vector<10x288xf32> to vector<5x24xf32>
    %43 = vector.extract_strided_slice %41 {offsets = [0, 96], sizes = [5, 24], strides = [1, 1]} : vector<10x288xf32> to vector<5x24xf32>
    %44 = vector.extract_strided_slice %41 {offsets = [0, 192], sizes = [5, 24], strides = [1, 1]} : vector<10x288xf32> to vector<5x24xf32>
    %45 = arith.truncf %42 : vector<5x24xf32> to vector<5x24xbf16>
    %46 = arith.truncf %43 : vector<5x24xf32> to vector<5x24xbf16>
    %cst_26 = arith.constant dense<0.000000e+00> : vector<5x5xf32>
    %47 = tpu.matmul %45, %46, %cst_26 {dimension_numbers = #tpu.dot_dimension_numbers<[1], [1], [0], [0], [0, 0, 1, 0], [], []>} : vector<5x24xbf16>, vector<5x24xbf16>, vector<5x5xf32> -> vector<5x5xf32>
    %cst_27 = arith.constant 0.204124153 : f32
    %48 = vector.broadcast %cst_27 : f32 to vector<5x5xf32>
    %49 = arith.mulf %47, %48 : vector<5x5xf32>
    %cst_28 = arith.constant dense<0xFF800000> : vector<5xf32>
    %50 = vector.multi_reduction <maximumf>, %49, %cst_28 [1] : vector<5x5xf32> to vector<5xf32>
    %51 = vector.shape_cast %50 : vector<5xf32> to vector<5x1xf32>
    %52 = vector.broadcast %51 : vector<5x1xf32> to vector<5x5xf32>
    %53 = arith.subf %49, %52 : vector<5x5xf32>
    %54 = math.exp %53 : vector<5x5xf32>
    %cst_29 = arith.constant dense<0.000000e+00> : vector<5xf32>
    %55 = vector.multi_reduction <add>, %54, %cst_29 [1] : vector<5x5xf32> to vector<5xf32>
    %56 = vector.shape_cast %55 : vector<5xf32> to vector<5x1xf32>
    %57 = tpu.reciprocal %56 {approx = true} : vector<5x1xf32> -> vector<5x1xf32>
    %58 = vector.broadcast %57 : vector<5x1xf32> to vector<5x5xf32>
    %59 = arith.mulf %54, %58 : vector<5x5xf32>
    %60 = arith.truncf %59 : vector<5x5xf32> to vector<5x5xbf16>
    %61 = arith.truncf %44 : vector<5x24xf32> to vector<5x24xbf16>
    %cst_30 = arith.constant dense<0.000000e+00> : vector<5x24xf32>
    %62 = tpu.matmul %60, %61, %cst_30 {dimension_numbers = #tpu.dot_dimension_numbers<[1], [0], [0], [1], [0, 0, 1, 1], [], []>} : vector<5x5xbf16>, vector<5x24xbf16>, vector<5x24xf32> -> vector<5x24xf32>
    %63 = vector.extract_strided_slice %41 {offsets = [0, 24], sizes = [5, 24], strides = [1, 1]} : vector<10x288xf32> to vector<5x24xf32>
    %64 = vector.extract_strided_slice %41 {offsets = [0, 120], sizes = [5, 24], strides = [1, 1]} : vector<10x288xf32> to vector<5x24xf32>
    %65 = vector.extract_strided_slice %41 {offsets = [0, 216], sizes = [5, 24], strides = [1, 1]} : vector<10x288xf32> to vector<5x24xf32>
    %66 = arith.truncf %63 : vector<5x24xf32> to vector<5x24xbf16>
    %67 = arith.truncf %64 : vector<5x24xf32> to vector<5x24xbf16>
    %cst_31 = arith.constant dense<0.000000e+00> : vector<5x5xf32>
    %68 = tpu.matmul %66, %67, %cst_31 {dimension_numbers = #tpu.dot_dimension_numbers<[1], [1], [0], [0], [0, 0, 1, 0], [], []>} : vector<5x24xbf16>, vector<5x24xbf16>, vector<5x5xf32> -> vector<5x5xf32>
    %cst_32 = arith.constant 0.204124153 : f32
    %69 = vector.broadcast %cst_32 : f32 to vector<5x5xf32>
    %70 = arith.mulf %68, %69 : vector<5x5xf32>
    %cst_33 = arith.constant dense<0xFF800000> : vector<5xf32>
    %71 = vector.multi_reduction <maximumf>, %70, %cst_33 [1] : vector<5x5xf32> to vector<5xf32>
    %72 = vector.shape_cast %71 : vector<5xf32> to vector<5x1xf32>
    %73 = vector.broadcast %72 : vector<5x1xf32> to vector<5x5xf32>
    %74 = arith.subf %70, %73 : vector<5x5xf32>
    %75 = math.exp %74 : vector<5x5xf32>
    %cst_34 = arith.constant dense<0.000000e+00> : vector<5xf32>
    %76 = vector.multi_reduction <add>, %75, %cst_34 [1] : vector<5x5xf32> to vector<5xf32>
    %77 = vector.shape_cast %76 : vector<5xf32> to vector<5x1xf32>
    %78 = tpu.reciprocal %77 {approx = true} : vector<5x1xf32> -> vector<5x1xf32>
    %79 = vector.broadcast %78 : vector<5x1xf32> to vector<5x5xf32>
    %80 = arith.mulf %75, %79 : vector<5x5xf32>
    %81 = arith.truncf %80 : vector<5x5xf32> to vector<5x5xbf16>
    %82 = arith.truncf %65 : vector<5x24xf32> to vector<5x24xbf16>
    %cst_35 = arith.constant dense<0.000000e+00> : vector<5x24xf32>
    %83 = tpu.matmul %81, %82, %cst_35 {dimension_numbers = #tpu.dot_dimension_numbers<[1], [0], [0], [1], [0, 0, 1, 1], [], []>} : vector<5x5xbf16>, vector<5x24xbf16>, vector<5x24xf32> -> vector<5x24xf32>
    %84 = vector.extract_strided_slice %41 {offsets = [0, 48], sizes = [5, 24], strides = [1, 1]} : vector<10x288xf32> to vector<5x24xf32>
    %85 = vector.extract_strided_slice %41 {offsets = [0, 144], sizes = [5, 24], strides = [1, 1]} : vector<10x288xf32> to vector<5x24xf32>
    %86 = vector.extract_strided_slice %41 {offsets = [0, 240], sizes = [5, 24], strides = [1, 1]} : vector<10x288xf32> to vector<5x24xf32>
    %87 = arith.truncf %84 : vector<5x24xf32> to vector<5x24xbf16>
    %88 = arith.truncf %85 : vector<5x24xf32> to vector<5x24xbf16>
    %cst_36 = arith.constant dense<0.000000e+00> : vector<5x5xf32>
    %89 = tpu.matmul %87, %88, %cst_36 {dimension_numbers = #tpu.dot_dimension_numbers<[1], [1], [0], [0], [0, 0, 1, 0], [], []>} : vector<5x24xbf16>, vector<5x24xbf16>, vector<5x5xf32> -> vector<5x5xf32>
    %cst_37 = arith.constant 0.204124153 : f32
    %90 = vector.broadcast %cst_37 : f32 to vector<5x5xf32>
    %91 = arith.mulf %89, %90 : vector<5x5xf32>
    %cst_38 = arith.constant dense<0xFF800000> : vector<5xf32>
    %92 = vector.multi_reduction <maximumf>, %91, %cst_38 [1] : vector<5x5xf32> to vector<5xf32>
    %93 = vector.shape_cast %92 : vector<5xf32> to vector<5x1xf32>
    %94 = vector.broadcast %93 : vector<5x1xf32> to vector<5x5xf32>
    %95 = arith.subf %91, %94 : vector<5x5xf32>
    %96 = math.exp %95 : vector<5x5xf32>
    %cst_39 = arith.constant dense<0.000000e+00> : vector<5xf32>
    %97 = vector.multi_reduction <add>, %96, %cst_39 [1] : vector<5x5xf32> to vector<5xf32>
    %98 = vector.shape_cast %97 : vector<5xf32> to vector<5x1xf32>
    %99 = tpu.reciprocal %98 {approx = true} : vector<5x1xf32> -> vector<5x1xf32>
    %100 = vector.broadcast %99 : vector<5x1xf32> to vector<5x5xf32>
    %101 = arith.mulf %96, %100 : vector<5x5xf32>
    %102 = arith.truncf %101 : vector<5x5xf32> to vector<5x5xbf16>
    %103 = arith.truncf %86 : vector<5x24xf32> to vector<5x24xbf16>
    %cst_40 = arith.constant dense<0.000000e+00> : vector<5x24xf32>
    %104 = tpu.matmul %102, %103, %cst_40 {dimension_numbers = #tpu.dot_dimension_numbers<[1], [0], [0], [1], [0, 0, 1, 1], [], []>} : vector<5x5xbf16>, vector<5x24xbf16>, vector<5x24xf32> -> vector<5x24xf32>
    %105 = vector.extract_strided_slice %41 {offsets = [0, 72], sizes = [5, 24], strides = [1, 1]} : vector<10x288xf32> to vector<5x24xf32>
    %106 = vector.extract_strided_slice %41 {offsets = [0, 168], sizes = [5, 24], strides = [1, 1]} : vector<10x288xf32> to vector<5x24xf32>
    %107 = vector.extract_strided_slice %41 {offsets = [0, 264], sizes = [5, 24], strides = [1, 1]} : vector<10x288xf32> to vector<5x24xf32>
    %108 = arith.truncf %105 : vector<5x24xf32> to vector<5x24xbf16>
    %109 = arith.truncf %106 : vector<5x24xf32> to vector<5x24xbf16>
    %cst_41 = arith.constant dense<0.000000e+00> : vector<5x5xf32>
    %110 = tpu.matmul %108, %109, %cst_41 {dimension_numbers = #tpu.dot_dimension_numbers<[1], [1], [0], [0], [0, 0, 1, 0], [], []>} : vector<5x24xbf16>, vector<5x24xbf16>, vector<5x5xf32> -> vector<5x5xf32>
    %cst_42 = arith.constant 0.204124153 : f32
    %111 = vector.broadcast %cst_42 : f32 to vector<5x5xf32>
    %112 = arith.mulf %110, %111 : vector<5x5xf32>
    %cst_43 = arith.constant dense<0xFF800000> : vector<5xf32>
    %113 = vector.multi_reduction <maximumf>, %112, %cst_43 [1] : vector<5x5xf32> to vector<5xf32>
    %114 = vector.shape_cast %113 : vector<5xf32> to vector<5x1xf32>
    %115 = vector.broadcast %114 : vector<5x1xf32> to vector<5x5xf32>
    %116 = arith.subf %112, %115 : vector<5x5xf32>
    %117 = math.exp %116 : vector<5x5xf32>
    %cst_44 = arith.constant dense<0.000000e+00> : vector<5xf32>
    %118 = vector.multi_reduction <add>, %117, %cst_44 [1] : vector<5x5xf32> to vector<5xf32>
    %119 = vector.shape_cast %118 : vector<5xf32> to vector<5x1xf32>
    %120 = tpu.reciprocal %119 {approx = true} : vector<5x1xf32> -> vector<5x1xf32>
    %121 = vector.broadcast %120 : vector<5x1xf32> to vector<5x5xf32>
    %122 = arith.mulf %117, %121 : vector<5x5xf32>
    %123 = arith.truncf %122 : vector<5x5xf32> to vector<5x5xbf16>
    %124 = arith.truncf %107 : vector<5x24xf32> to vector<5x24xbf16>
    %cst_45 = arith.constant dense<0.000000e+00> : vector<5x24xf32>
    %125 = tpu.matmul %123, %124, %cst_45 {dimension_numbers = #tpu.dot_dimension_numbers<[1], [0], [0], [1], [0, 0, 1, 1], [], []>} : vector<5x5xbf16>, vector<5x24xbf16>, vector<5x24xf32> -> vector<5x24xf32>
    %126 = tpu.concatenate %62, %83, %104, %125 in 1 : vector<5x24xf32>, vector<5x24xf32>, vector<5x24xf32>, vector<5x24xf32> -> vector<5x96xf32>
    %127 = vector.extract_strided_slice %41 {offsets = [5, 0], sizes = [5, 24], strides = [1, 1]} : vector<10x288xf32> to vector<5x24xf32>
    %128 = vector.extract_strided_slice %41 {offsets = [5, 96], sizes = [5, 24], strides = [1, 1]} : vector<10x288xf32> to vector<5x24xf32>
    %129 = vector.extract_strided_slice %41 {offsets = [5, 192], sizes = [5, 24], strides = [1, 1]} : vector<10x288xf32> to vector<5x24xf32>
    %130 = arith.truncf %127 : vector<5x24xf32> to vector<5x24xbf16>
    %131 = arith.truncf %128 : vector<5x24xf32> to vector<5x24xbf16>
    %cst_46 = arith.constant dense<0.000000e+00> : vector<5x5xf32>
    %132 = tpu.matmul %130, %131, %cst_46 {dimension_numbers = #tpu.dot_dimension_numbers<[1], [1], [0], [0], [0, 0, 1, 0], [], []>} : vector<5x24xbf16>, vector<5x24xbf16>, vector<5x5xf32> -> vector<5x5xf32>
    %cst_47 = arith.constant 0.204124153 : f32
    %133 = vector.broadcast %cst_47 : f32 to vector<5x5xf32>
    %134 = arith.mulf %132, %133 : vector<5x5xf32>
    %cst_48 = arith.constant dense<0xFF800000> : vector<5xf32>
    %135 = vector.multi_reduction <maximumf>, %134, %cst_48 [1] : vector<5x5xf32> to vector<5xf32>
    %136 = vector.shape_cast %135 : vector<5xf32> to vector<5x1xf32>
    %137 = vector.broadcast %136 : vector<5x1xf32> to vector<5x5xf32>
    %138 = arith.subf %134, %137 : vector<5x5xf32>
    %139 = math.exp %138 : vector<5x5xf32>
    %cst_49 = arith.constant dense<0.000000e+00> : vector<5xf32>
    %140 = vector.multi_reduction <add>, %139, %cst_49 [1] : vector<5x5xf32> to vector<5xf32>
    %141 = vector.shape_cast %140 : vector<5xf32> to vector<5x1xf32>
    %142 = tpu.reciprocal %141 {approx = true} : vector<5x1xf32> -> vector<5x1xf32>
    %143 = vector.broadcast %142 : vector<5x1xf32> to vector<5x5xf32>
    %144 = arith.mulf %139, %143 : vector<5x5xf32>
    %145 = arith.truncf %144 : vector<5x5xf32> to vector<5x5xbf16>
    %146 = arith.truncf %129 : vector<5x24xf32> to vector<5x24xbf16>
    %cst_50 = arith.constant dense<0.000000e+00> : vector<5x24xf32>
    %147 = tpu.matmul %145, %146, %cst_50 {dimension_numbers = #tpu.dot_dimension_numbers<[1], [0], [0], [1], [0, 0, 1, 1], [], []>} : vector<5x5xbf16>, vector<5x24xbf16>, vector<5x24xf32> -> vector<5x24xf32>
    %148 = vector.extract_strided_slice %41 {offsets = [5, 24], sizes = [5, 24], strides = [1, 1]} : vector<10x288xf32> to vector<5x24xf32>
    %149 = vector.extract_strided_slice %41 {offsets = [5, 120], sizes = [5, 24], strides = [1, 1]} : vector<10x288xf32> to vector<5x24xf32>
    %150 = vector.extract_strided_slice %41 {offsets = [5, 216], sizes = [5, 24], strides = [1, 1]} : vector<10x288xf32> to vector<5x24xf32>
    %151 = arith.truncf %148 : vector<5x24xf32> to vector<5x24xbf16>
    %152 = arith.truncf %149 : vector<5x24xf32> to vector<5x24xbf16>
    %cst_51 = arith.constant dense<0.000000e+00> : vector<5x5xf32>
    %153 = tpu.matmul %151, %152, %cst_51 {dimension_numbers = #tpu.dot_dimension_numbers<[1], [1], [0], [0], [0, 0, 1, 0], [], []>} : vector<5x24xbf16>, vector<5x24xbf16>, vector<5x5xf32> -> vector<5x5xf32>
    %cst_52 = arith.constant 0.204124153 : f32
    %154 = vector.broadcast %cst_52 : f32 to vector<5x5xf32>
    %155 = arith.mulf %153, %154 : vector<5x5xf32>
    %cst_53 = arith.constant dense<0xFF800000> : vector<5xf32>
    %156 = vector.multi_reduction <maximumf>, %155, %cst_53 [1] : vector<5x5xf32> to vector<5xf32>
    %157 = vector.shape_cast %156 : vector<5xf32> to vector<5x1xf32>
    %158 = vector.broadcast %157 : vector<5x1xf32> to vector<5x5xf32>
    %159 = arith.subf %155, %158 : vector<5x5xf32>
    %160 = math.exp %159 : vector<5x5xf32>
    %cst_54 = arith.constant dense<0.000000e+00> : vector<5xf32>
    %161 = vector.multi_reduction <add>, %160, %cst_54 [1] : vector<5x5xf32> to vector<5xf32>
    %162 = vector.shape_cast %161 : vector<5xf32> to vector<5x1xf32>
    %163 = tpu.reciprocal %162 {approx = true} : vector<5x1xf32> -> vector<5x1xf32>
    %164 = vector.broadcast %163 : vector<5x1xf32> to vector<5x5xf32>
    %165 = arith.mulf %160, %164 : vector<5x5xf32>
    %166 = arith.truncf %165 : vector<5x5xf32> to vector<5x5xbf16>
    %167 = arith.truncf %150 : vector<5x24xf32> to vector<5x24xbf16>
    %cst_55 = arith.constant dense<0.000000e+00> : vector<5x24xf32>
    %168 = tpu.matmul %166, %167, %cst_55 {dimension_numbers = #tpu.dot_dimension_numbers<[1], [0], [0], [1], [0, 0, 1, 1], [], []>} : vector<5x5xbf16>, vector<5x24xbf16>, vector<5x24xf32> -> vector<5x24xf32>
    %169 = vector.extract_strided_slice %41 {offsets = [5, 48], sizes = [5, 24], strides = [1, 1]} : vector<10x288xf32> to vector<5x24xf32>
    %170 = vector.extract_strided_slice %41 {offsets = [5, 144], sizes = [5, 24], strides = [1, 1]} : vector<10x288xf32> to vector<5x24xf32>
    %171 = vector.extract_strided_slice %41 {offsets = [5, 240], sizes = [5, 24], strides = [1, 1]} : vector<10x288xf32> to vector<5x24xf32>
    %172 = arith.truncf %169 : vector<5x24xf32> to vector<5x24xbf16>
    %173 = arith.truncf %170 : vector<5x24xf32> to vector<5x24xbf16>
    %cst_56 = arith.constant dense<0.000000e+00> : vector<5x5xf32>
    %174 = tpu.matmul %172, %173, %cst_56 {dimension_numbers = #tpu.dot_dimension_numbers<[1], [1], [0], [0], [0, 0, 1, 0], [], []>} : vector<5x24xbf16>, vector<5x24xbf16>, vector<5x5xf32> -> vector<5x5xf32>
    %cst_57 = arith.constant 0.204124153 : f32
    %175 = vector.broadcast %cst_57 : f32 to vector<5x5xf32>
    %176 = arith.mulf %174, %175 : vector<5x5xf32>
    %cst_58 = arith.constant dense<0xFF800000> : vector<5xf32>
    %177 = vector.multi_reduction <maximumf>, %176, %cst_58 [1] : vector<5x5xf32> to vector<5xf32>
    %178 = vector.shape_cast %177 : vector<5xf32> to vector<5x1xf32>
    %179 = vector.broadcast %178 : vector<5x1xf32> to vector<5x5xf32>
    %180 = arith.subf %176, %179 : vector<5x5xf32>
    %181 = math.exp %180 : vector<5x5xf32>
    %cst_59 = arith.constant dense<0.000000e+00> : vector<5xf32>
    %182 = vector.multi_reduction <add>, %181, %cst_59 [1] : vector<5x5xf32> to vector<5xf32>
    %183 = vector.shape_cast %182 : vector<5xf32> to vector<5x1xf32>
    %184 = tpu.reciprocal %183 {approx = true} : vector<5x1xf32> -> vector<5x1xf32>
    %185 = vector.broadcast %184 : vector<5x1xf32> to vector<5x5xf32>
    %186 = arith.mulf %181, %185 : vector<5x5xf32>
    %187 = arith.truncf %186 : vector<5x5xf32> to vector<5x5xbf16>
    %188 = arith.truncf %171 : vector<5x24xf32> to vector<5x24xbf16>
    %cst_60 = arith.constant dense<0.000000e+00> : vector<5x24xf32>
    %189 = tpu.matmul %187, %188, %cst_60 {dimension_numbers = #tpu.dot_dimension_numbers<[1], [0], [0], [1], [0, 0, 1, 1], [], []>} : vector<5x5xbf16>, vector<5x24xbf16>, vector<5x24xf32> -> vector<5x24xf32>
    %190 = vector.extract_strided_slice %41 {offsets = [5, 72], sizes = [5, 24], strides = [1, 1]} : vector<10x288xf32> to vector<5x24xf32>
    %191 = vector.extract_strided_slice %41 {offsets = [5, 168], sizes = [5, 24], strides = [1, 1]} : vector<10x288xf32> to vector<5x24xf32>
    %192 = vector.extract_strided_slice %41 {offsets = [5, 264], sizes = [5, 24], strides = [1, 1]} : vector<10x288xf32> to vector<5x24xf32>
    %193 = arith.truncf %190 : vector<5x24xf32> to vector<5x24xbf16>
    %194 = arith.truncf %191 : vector<5x24xf32> to vector<5x24xbf16>
    %cst_61 = arith.constant dense<0.000000e+00> : vector<5x5xf32>
    %195 = tpu.matmul %193, %194, %cst_61 {dimension_numbers = #tpu.dot_dimension_numbers<[1], [1], [0], [0], [0, 0, 1, 0], [], []>} : vector<5x24xbf16>, vector<5x24xbf16>, vector<5x5xf32> -> vector<5x5xf32>
    %cst_62 = arith.constant 0.204124153 : f32
    %196 = vector.broadcast %cst_62 : f32 to vector<5x5xf32>
    %197 = arith.mulf %195, %196 : vector<5x5xf32>
    %cst_63 = arith.constant dense<0xFF800000> : vector<5xf32>
    %198 = vector.multi_reduction <maximumf>, %197, %cst_63 [1] : vector<5x5xf32> to vector<5xf32>
    %199 = vector.shape_cast %198 : vector<5xf32> to vector<5x1xf32>
    %200 = vector.broadcast %199 : vector<5x1xf32> to vector<5x5xf32>
    %201 = arith.subf %197, %200 : vector<5x5xf32>
    %202 = math.exp %201 : vector<5x5xf32>
    %cst_64 = arith.constant dense<0.000000e+00> : vector<5xf32>
    %203 = vector.multi_reduction <add>, %202, %cst_64 [1] : vector<5x5xf32> to vector<5xf32>
    %204 = vector.shape_cast %203 : vector<5xf32> to vector<5x1xf32>
    %205 = tpu.reciprocal %204 {approx = true} : vector<5x1xf32> -> vector<5x1xf32>
    %206 = vector.broadcast %205 : vector<5x1xf32> to vector<5x5xf32>
    %207 = arith.mulf %202, %206 : vector<5x5xf32>
    %208 = arith.truncf %207 : vector<5x5xf32> to vector<5x5xbf16>
    %209 = arith.truncf %192 : vector<5x24xf32> to vector<5x24xbf16>
    %cst_65 = arith.constant dense<0.000000e+00> : vector<5x24xf32>
    %210 = tpu.matmul %208, %209, %cst_65 {dimension_numbers = #tpu.dot_dimension_numbers<[1], [0], [0], [1], [0, 0, 1, 1], [], []>} : vector<5x5xbf16>, vector<5x24xbf16>, vector<5x24xf32> -> vector<5x24xf32>
    %211 = tpu.concatenate %147, %168, %189, %210 in 1 : vector<5x24xf32>, vector<5x24xf32>, vector<5x24xf32>, vector<5x24xf32> -> vector<5x96xf32>
    %212 = tpu.concatenate %126, %211 in 0 : vector<5x96xf32>, vector<5x96xf32> -> vector<10x96xf32>
    %c0_66 = arith.constant 0 : index
    %c0_67 = arith.constant 0 : index
    %c0_68 = arith.constant 0 : index
    %213 = vector.load %arg8[%c0_66, %c0_67, %c0_68] : memref<1x96x96xbf16, #tpu.memory_space<vmem>>, vector<1x96x96xbf16>
    %214 = vector.shape_cast %213 : vector<1x96x96xbf16> to vector<96x96xbf16>
    %215 = arith.truncf %212 : vector<10x96xf32> to vector<10x96xbf16>
    %cst_69 = arith.constant dense<0.000000e+00> : vector<10x96xf32>
    %216 = tpu.matmul %215, %214, %cst_69 {dimension_numbers = #tpu.dot_dimension_numbers<[1], [0], [0], [1], [0, 0, 1, 1], [], []>} : vector<10x96xbf16>, vector<96x96xbf16>, vector<10x96xf32> -> vector<10x96xf32>
    %217 = arith.addf %11, %216 : vector<10x96xf32>
    %c0_70 = arith.constant 0 : index
    %c0_71 = arith.constant 0 : index
    %c0_72 = arith.constant 0 : index
    %218 = vector.load %arg9[%c0_70, %c0_71, %c0_72] : memref<1x1x96xf32, #tpu.memory_space<vmem>>, vector<1x1x96xf32>
    %219 = vector.shape_cast %218 : vector<1x1x96xf32> to vector<1x96xf32>
    %220 = vector.broadcast %219 : vector<1x96xf32> to vector<10x96xf32>
    %221 = arith.addf %217, %220 : vector<10x96xf32>
    %cst_73 = arith.constant dense<0.000000e+00> : vector<10xf32>
    %222 = vector.multi_reduction <add>, %221, %cst_73 [1] : vector<10x96xf32> to vector<10xf32>
    %223 = vector.shape_cast %222 : vector<10xf32> to vector<10x1xf32>
    %cst_74 = arith.constant 9.600000e+01 : f32
    %224 = vector.broadcast %cst_74 : f32 to vector<10x1xf32>
    %225 = arith.divf %223, %224 : vector<10x1xf32>
    %226 = vector.broadcast %225 : vector<10x1xf32> to vector<10x96xf32>
    %227 = arith.subf %221, %226 : vector<10x96xf32>
    %228 = arith.mulf %227, %227 : vector<10x96xf32>
    %cst_75 = arith.constant dense<0.000000e+00> : vector<10xf32>
    %229 = vector.multi_reduction <add>, %228, %cst_75 [1] : vector<10x96xf32> to vector<10xf32>
    %230 = vector.shape_cast %229 : vector<10xf32> to vector<10x1xf32>
    %cst_76 = arith.constant 9.600000e+01 : f32
    %231 = vector.broadcast %cst_76 : f32 to vector<10x1xf32>
    %232 = arith.divf %230, %231 : vector<10x1xf32>
    %233 = vector.broadcast %225 : vector<10x1xf32> to vector<10x96xf32>
    %234 = arith.subf %221, %233 : vector<10x96xf32>
    %cst_77 = arith.constant 9.99999996E-13 : f32
    %235 = vector.broadcast %cst_77 : f32 to vector<10x1xf32>
    %236 = arith.addf %232, %235 : vector<10x1xf32>
    %237 = math.rsqrt %236 : vector<10x1xf32>
    %238 = vector.broadcast %237 : vector<10x1xf32> to vector<10x96xf32>
    %239 = arith.mulf %234, %238 : vector<10x96xf32>
    %240 = vector.broadcast %8 : vector<1x96xf32> to vector<10x96xf32>
    %241 = arith.mulf %239, %240 : vector<10x96xf32>
    %242 = vector.broadcast %10 : vector<1x96xf32> to vector<10x96xf32>
    %243 = arith.addf %241, %242 : vector<10x96xf32>
    %c0_78 = arith.constant 0 : index
    %c0_79 = arith.constant 0 : index
    %c0_80 = arith.constant 0 : index
    %244 = vector.load %arg10[%c0_78, %c0_79, %c0_80] : memref<1x96x384xbf16, #tpu.memory_space<vmem>>, vector<1x96x384xbf16>
    %245 = vector.shape_cast %244 : vector<1x96x384xbf16> to vector<96x384xbf16>
    %246 = arith.truncf %243 : vector<10x96xf32> to vector<10x96xbf16>
    %cst_81 = arith.constant dense<0.000000e+00> : vector<10x384xf32>
    %247 = tpu.matmul %246, %245, %cst_81 {dimension_numbers = #tpu.dot_dimension_numbers<[1], [0], [0], [1], [0, 0, 1, 1], [], []>} : vector<10x96xbf16>, vector<96x384xbf16>, vector<10x384xf32> -> vector<10x384xf32>
    %c0_82 = arith.constant 0 : index
    %c0_83 = arith.constant 0 : index
    %c0_84 = arith.constant 0 : index
    %248 = vector.load %arg11[%c0_82, %c0_83, %c0_84] : memref<1x1x384xf32, #tpu.memory_space<vmem>>, vector<1x1x384xf32>
    %249 = vector.shape_cast %248 : vector<1x1x384xf32> to vector<1x384xf32>
    %250 = vector.broadcast %249 : vector<1x384xf32> to vector<10x384xf32>
    %251 = arith.addf %247, %250 : vector<10x384xf32>
    %252 = arith.mulf %251, %251 : vector<10x384xf32>
    %253 = arith.mulf %251, %252 : vector<10x384xf32>
    %cst_85 = arith.constant 4.471500e-02 : f32
    %254 = vector.broadcast %cst_85 : f32 to vector<10x384xf32>
    %255 = arith.mulf %254, %253 : vector<10x384xf32>
    %256 = arith.addf %251, %255 : vector<10x384xf32>
    %cst_86 = arith.constant 0.797884583 : f32
    %257 = vector.broadcast %cst_86 : f32 to vector<10x384xf32>
    %258 = arith.mulf %257, %256 : vector<10x384xf32>
    %259 = math.tanh %258 : vector<10x384xf32>
    %cst_87 = arith.constant 1.000000e+00 : f32
    %260 = vector.broadcast %cst_87 : f32 to vector<10x384xf32>
    %261 = arith.addf %260, %259 : vector<10x384xf32>
    %cst_88 = arith.constant 5.000000e-01 : f32
    %262 = vector.broadcast %cst_88 : f32 to vector<10x384xf32>
    %263 = arith.mulf %262, %261 : vector<10x384xf32>
    %264 = arith.mulf %251, %263 : vector<10x384xf32>
    %c0_89 = arith.constant 0 : index
    %c0_90 = arith.constant 0 : index
    %c0_91 = arith.constant 0 : index
    %265 = vector.load %arg12[%c0_89, %c0_90, %c0_91] : memref<1x384x96xbf16, #tpu.memory_space<vmem>>, vector<1x384x96xbf16>
    %266 = vector.shape_cast %265 : vector<1x384x96xbf16> to vector<384x96xbf16>
    %267 = arith.truncf %264 : vector<10x384xf32> to vector<10x384xbf16>
    %cst_92 = arith.constant dense<0.000000e+00> : vector<10x96xf32>
    %268 = tpu.matmul %267, %266, %cst_92 {dimension_numbers = #tpu.dot_dimension_numbers<[1], [0], [0], [1], [0, 0, 1, 1], [], []>} : vector<10x384xbf16>, vector<384x96xbf16>, vector<10x96xf32> -> vector<10x96xf32>
    %269 = arith.addf %221, %268 : vector<10x96xf32>
    %c0_93 = arith.constant 0 : index
    %c0_94 = arith.constant 0 : index
    %c0_95 = arith.constant 0 : index
    %270 = vector.load %arg13[%c0_93, %c0_94, %c0_95] : memref<1x1x96xf32, #tpu.memory_space<vmem>>, vector<1x1x96xf32>
    %271 = vector.shape_cast %270 : vector<1x1x96xf32> to vector<1x96xf32>
    %272 = vector.broadcast %271 : vector<1x96xf32> to vector<10x96xf32>
    %273 = arith.addf %269, %272 : vector<10x96xf32>
    %c0_96 = arith.constant 0 : index
    %c0_97 = arith.constant 0 : index
    %274 = vector.load %arg28[%c0_96, %c0_97] : memref<10x96xf32, #tpu.memory_space<vmem>>, vector<10x96xf32>
    tpu.vector_store %arg28[%c0_96, %c0_97], %273 {strides = array<i32>} : memref<10x96xf32, #tpu.memory_space<vmem>>, vector<10x96xf32>,
    %c1_i32 = arith.constant 1 : i32
    %275 = arith.cmpi eq, %arg0, %c1_i32 : i32
    %276 = arith.extui %275 : i1 to i32
    %c0_i32_98 = arith.constant 0 : i32
    %277 = arith.cmpi ne, %276, %c0_i32_98 : i32
    scf.if %277 {
      %278 = vector.extract_strided_slice %273 {offsets = [0, 0], sizes = [1, 96], strides = [1, 1]} : vector<10x96xf32> to vector<1x96xf32>
      %279 = vector.extract_strided_slice %273 {offsets = [5, 0], sizes = [1, 96], strides = [1, 1]} : vector<10x96xf32> to vector<1x96xf32>
      %280 = tpu.concatenate %278, %279 in 0 : vector<1x96xf32>, vector<1x96xf32> -> vector<2x96xf32>
      %c0_99 = arith.constant 0 : index
      %c0_100 = arith.constant 0 : index
      %281 = vector.load %arg27[%c0_99, %c0_100] : memref<2x96xf32, #tpu.memory_space<vmem>>, vector<2x96xf32>
      tpu.vector_store %arg27[%c0_99, %c0_100], %280 {strides = array<i32>} : memref<2x96xf32, #tpu.memory_space<vmem>>, vector<2x96xf32>,
      %c0_101 = arith.constant 0 : index
      %c0_102 = arith.constant 0 : index
      %282 = vector.load %arg14[%c0_101, %c0_102] : memref<96x64xbf16, #tpu.memory_space<vmem>>, vector<96x64xbf16>
      %283 = arith.truncf %280 : vector<2x96xf32> to vector<2x96xbf16>
      %cst_103 = arith.constant dense<0.000000e+00> : vector<2x64xf32>
      %284 = tpu.matmul %283, %282, %cst_103 {dimension_numbers = #tpu.dot_dimension_numbers<[1], [0], [0], [1], [0, 0, 1, 1], [], []>} : vector<2x96xbf16>, vector<96x64xbf16>, vector<2x64xf32> -> vector<2x64xf32>
      %c0_104 = arith.constant 0 : index
      %c0_105 = arith.constant 0 : index
      %285 = vector.load %arg15[%c0_104, %c0_105] : memref<1x64xf32, #tpu.memory_space<vmem>>, vector<1x64xf32>
      %286 = vector.broadcast %285 : vector<1x64xf32> to vector<2x64xf32>
      %287 = arith.addf %284, %286 : vector<2x64xf32>
      %c0_106 = arith.constant 0 : index
      %c0_107 = arith.constant 0 : index
      %288 = vector.load %arg16[%c0_106, %c0_107] : memref<1x64xf32, #tpu.memory_space<vmem>>, vector<1x64xf32>
      %289 = vector.broadcast %288 : vector<1x64xf32> to vector<2x64xf32>
      %290 = arith.mulf %287, %289 : vector<2x64xf32>
      %cst_108 = arith.constant dense<0.000000e+00> : vector<2xf32>
      %291 = vector.multi_reduction <add>, %290, %cst_108 [1] : vector<2x64xf32> to vector<2xf32>
      %292 = vector.shape_cast %291 : vector<2xf32> to vector<2x1xf32>
      %c0_109 = arith.constant 0 : index
      %c0_110 = arith.constant 0 : index
      %293 = vector.load %arg17[%c0_109, %c0_110] : memref<1x1xf32, #tpu.memory_space<vmem>>, vector<1x1xf32>
      %294 = vector.broadcast %293 : vector<1x1xf32> to vector<2x1xf32>
      %295 = arith.addf %292, %294 : vector<2x1xf32>
      %c0_111 = arith.constant 0 : index
      %c0_112 = arith.constant 0 : index
      %296 = vector.load %arg18[%c0_111, %c0_112] : memref<96x128xbf16, #tpu.memory_space<vmem>>, vector<96x128xbf16>
      %297 = arith.truncf %280 : vector<2x96xf32> to vector<2x96xbf16>
      %cst_113 = arith.constant dense<0.000000e+00> : vector<2x128xf32>
      %298 = tpu.matmul %297, %296, %cst_113 {dimension_numbers = #tpu.dot_dimension_numbers<[1], [0], [0], [1], [0, 0, 1, 1], [], []>} : vector<2x96xbf16>, vector<96x128xbf16>, vector<2x128xf32> -> vector<2x128xf32>
      %c0_114 = arith.constant 0 : index
      %c0_115 = arith.constant 0 : index
      %299 = vector.load %arg19[%c0_114, %c0_115] : memref<1x128xf32, #tpu.memory_space<vmem>>, vector<1x128xf32>
      %300 = vector.broadcast %295 : vector<2x1xf32> to vector<2x128xf32>
      %301 = vector.broadcast %299 : vector<1x128xf32> to vector<2x128xf32>
      %302 = arith.mulf %300, %301 : vector<2x128xf32>
      %303 = arith.addf %298, %302 : vector<2x128xf32>
      %c0_116 = arith.constant 0 : index
      %c0_117 = arith.constant 0 : index
      %304 = vector.load %arg20[%c0_116, %c0_117] : memref<1x128xf32, #tpu.memory_space<vmem>>, vector<1x128xf32>
      %305 = vector.broadcast %304 : vector<1x128xf32> to vector<2x128xf32>
      %306 = arith.addf %303, %305 : vector<2x128xf32>
      %c0_118 = arith.constant 0 : index
      %c0_119 = arith.constant 0 : index
      %307 = vector.load %arg21[%c0_118, %c0_119] : memref<128x64xbf16, #tpu.memory_space<vmem>>, vector<128x64xbf16>
      %308 = arith.truncf %306 : vector<2x128xf32> to vector<2x128xbf16>
      %cst_120 = arith.constant dense<0.000000e+00> : vector<2x64xf32>
      %309 = tpu.matmul %308, %307, %cst_120 {dimension_numbers = #tpu.dot_dimension_numbers<[1], [0], [0], [1], [0, 0, 1, 1], [], []>} : vector<2x128xbf16>, vector<128x64xbf16>, vector<2x64xf32> -> vector<2x64xf32>
      %c0_121 = arith.constant 0 : index
      %c0_122 = arith.constant 0 : index
      %310 = vector.load %arg22[%c0_121, %c0_122] : memref<1x64xf32, #tpu.memory_space<vmem>>, vector<1x64xf32>
      %311 = vector.broadcast %310 : vector<1x64xf32> to vector<2x64xf32>
      %312 = arith.addf %309, %311 : vector<2x64xf32>
      %c0_123 = arith.constant 0 : index
      %c0_124 = arith.constant 0 : index
      %313 = vector.load %arg23[%c0_123, %c0_124] : memref<64x2xbf16, #tpu.memory_space<vmem>>, vector<64x2xbf16>
      %314 = arith.truncf %312 : vector<2x64xf32> to vector<2x64xbf16>
      %cst_125 = arith.constant dense<0.000000e+00> : vector<2x2xf32>
      %315 = tpu.matmul %314, %313, %cst_125 {dimension_numbers = #tpu.dot_dimension_numbers<[1], [0], [0], [1], [0, 0, 1, 1], [], []>} : vector<2x64xbf16>, vector<64x2xbf16>, vector<2x2xf32> -> vector<2x2xf32>
      %c0_126 = arith.constant 0 : index
      %c0_127 = arith.constant 0 : index
      %316 = vector.load %arg24[%c0_126, %c0_127] : memref<1x2xf32, #tpu.memory_space<vmem>>, vector<1x2xf32>
      %317 = vector.broadcast %316 : vector<1x2xf32> to vector<2x2xf32>
      %318 = arith.addf %315, %317 : vector<2x2xf32>
      %c0_128 = arith.constant 0 : index
      %c0_129 = arith.constant 0 : index
      %319 = vector.load %arg25[%c0_128, %c0_129] : memref<2x2xf32, #tpu.memory_space<vmem>>, vector<2x2xf32>
      tpu.vector_store %arg25[%c0_128, %c0_129], %318 {strides = array<i32>} : memref<2x2xf32, #tpu.memory_space<vmem>>, vector<2x2xf32>,
      %c0_130 = arith.constant 0 : index
      %c0_131 = arith.constant 0 : index
      %320 = vector.load %arg26[%c0_130, %c0_131] : memref<2x1xf32, #tpu.memory_space<vmem>>, vector<2x1xf32>
      tpu.vector_store %arg26[%c0_130, %c0_131], %295 {strides = array<i32>} : memref<2x1xf32, #tpu.memory_space<vmem>>, vector<2x1xf32>,
    } else {
    }
    return
  }
  func.func @transform_0(%arg0: i32) -> (i32, i32) {
    %c0_i32 = arith.constant 0 : i32
    %c0_i32_0 = arith.constant 0 : i32
    %c0_i32_1 = arith.constant 0 : i32
    return %c0_i32, %c0_i32_0 : i32, i32
  }
  func.func @transform_1(%arg0: i32) -> (i32, i32) {
    %c0_i32 = arith.constant 0 : i32
    %c0_i32_0 = arith.constant 0 : i32
    %c0_i32_1 = arith.constant 0 : i32
    return %c0_i32, %c0_i32_0 : i32, i32
  }
  func.func @transform_2(%arg0: i32) -> (i32, i32) {
    %c0_i32 = arith.constant 0 : i32
    %c0_i32_0 = arith.constant 0 : i32
    %c0_i32_1 = arith.constant 0 : i32
    return %c0_i32, %c0_i32_0 : i32, i32
  }
  func.func @transform_3(%arg0: i32) -> (i32, i32) {
    %c0_i32 = arith.constant 0 : i32
    %c0_i32_0 = arith.constant 0 : i32
    %c0_i32_1 = arith.constant 0 : i32
    return %c0_i32, %c0_i32_0 : i32, i32
  }
  func.func @transform_4(%arg0: i32) -> (i32, i32, i32, i32) {
    %c0_i32 = arith.constant 0 : i32
    %c0_i32_0 = arith.constant 0 : i32
    %c0_i32_1 = arith.constant 0 : i32
    %c0_i32_2 = arith.constant 0 : i32
    return %arg0, %c0_i32, %c0_i32_0, %c0_i32_1 : i32, i32, i32, i32
  }
  func.func @transform_5(%arg0: i32) -> (i32, i32, i32) {
    %c0_i32 = arith.constant 0 : i32
    %c0_i32_0 = arith.constant 0 : i32
    %c0_i32_1 = arith.constant 0 : i32
    return %arg0, %c0_i32, %c0_i32_0 : i32, i32, i32
  }
  func.func @transform_6(%arg0: i32) -> (i32, i32, i32) {
    %c0_i32 = arith.constant 0 : i32
    %c0_i32_0 = arith.constant 0 : i32
    %c0_i32_1 = arith.constant 0 : i32
    return %arg0, %c0_i32, %c0_i32_0 : i32, i32, i32
  }
  func.func @transform_7(%arg0: i32) -> (i32, i32, i32) {
    %c0_i32 = arith.constant 0 : i32
    %c0_i32_0 = arith.constant 0 : i32
    %c0_i32_1 = arith.constant 0 : i32
    return %arg0, %c0_i32, %c0_i32_0 : i32, i32, i32
  }
  func.func @transform_8(%arg0: i32) -> (i32, i32, i32) {
    %c0_i32 = arith.constant 0 : i32
    %c0_i32_0 = arith.constant 0 : i32
    %c0_i32_1 = arith.constant 0 : i32
    return %arg0, %c0_i32, %c0_i32_0 : i32, i32, i32
  }
  func.func @transform_9(%arg0: i32) -> (i32, i32, i32) {
    %c0_i32 = arith.constant 0 : i32
    %c0_i32_0 = arith.constant 0 : i32
    %c0_i32_1 = arith.constant 0 : i32
    return %arg0, %c0_i32, %c0_i32_0 : i32, i32, i32
  }
  func.func @transform_10(%arg0: i32) -> (i32, i32, i32) {
    %c0_i32 = arith.constant 0 : i32
    %c0_i32_0 = arith.constant 0 : i32
    %c0_i32_1 = arith.constant 0 : i32
    return %arg0, %c0_i32, %c0_i32_0 : i32, i32, i32
  }
  func.func @transform_11(%arg0: i32) -> (i32, i32, i32) {
    %c0_i32 = arith.constant 0 : i32
    %c0_i32_0 = arith.constant 0 : i32
    %c0_i32_1 = arith.constant 0 : i32
    return %arg0, %c0_i32, %c0_i32_0 : i32, i32, i32
  }
  func.func @transform_12(%arg0: i32) -> (i32, i32, i32) {
    %c0_i32 = arith.constant 0 : i32
    %c0_i32_0 = arith.constant 0 : i32
    %c0_i32_1 = arith.constant 0 : i32
    return %arg0, %c0_i32, %c0_i32_0 : i32, i32, i32
  }
  func.func @transform_13(%arg0: i32) -> (i32, i32) {
    %c0_i32 = arith.constant 0 : i32
    %c0_i32_0 = arith.constant 0 : i32
    %c0_i32_1 = arith.constant 0 : i32
    return %c0_i32, %c0_i32_0 : i32, i32
  }
  func.func @transform_14(%arg0: i32) -> (i32, i32) {
    %c0_i32 = arith.constant 0 : i32
    %c0_i32_0 = arith.constant 0 : i32
    %c0_i32_1 = arith.constant 0 : i32
    return %c0_i32, %c0_i32_0 : i32, i32
  }
  func.func @transform_15(%arg0: i32) -> (i32, i32) {
    %c0_i32 = arith.constant 0 : i32
    %c0_i32_0 = arith.constant 0 : i32
    %c0_i32_1 = arith.constant 0 : i32
    return %c0_i32, %c0_i32_0 : i32, i32
  }
  func.func @transform_16(%arg0: i32) -> (i32, i32) {
    %c0_i32 = arith.constant 0 : i32
    %c0_i32_0 = arith.constant 0 : i32
    %c0_i32_1 = arith.constant 0 : i32
    return %c0_i32, %c0_i32_0 : i32, i32
  }
  func.func @transform_17(%arg0: i32) -> (i32, i32) {
    %c0_i32 = arith.constant 0 : i32
    %c0_i32_0 = arith.constant 0 : i32
    %c0_i32_1 = arith.constant 0 : i32
    return %c0_i32, %c0_i32_0 : i32, i32
  }
  func.func @transform_18(%arg0: i32) -> (i32, i32) {
    %c0_i32 = arith.constant 0 : i32
    %c0_i32_0 = arith.constant 0 : i32
    %c0_i32_1 = arith.constant 0 : i32
    return %c0_i32, %c0_i32_0 : i32, i32
  }
  func.func @transform_19(%arg0: i32) -> (i32, i32) {
    %c0_i32 = arith.constant 0 : i32
    %c0_i32_0 = arith.constant 0 : i32
    %c0_i32_1 = arith.constant 0 : i32
    return %c0_i32, %c0_i32_0 : i32, i32
  }
  func.func @transform_20(%arg0: i32) -> (i32, i32) {
    %c0_i32 = arith.constant 0 : i32
    %c0_i32_0 = arith.constant 0 : i32
    %c0_i32_1 = arith.constant 0 : i32
    return %c0_i32, %c0_i32_0 : i32, i32
  }
  func.func @transform_21(%arg0: i32) -> (i32, i32) {
    %c0_i32 = arith.constant 0 : i32
    %c0_i32_0 = arith.constant 0 : i32
    %c0_i32_1 = arith.constant 0 : i32
    return %c0_i32, %c0_i32_0 : i32, i32
  }
  func.func @transform_22(%arg0: i32) -> (i32, i32) {
    %c0_i32 = arith.constant 0 : i32
    %c0_i32_0 = arith.constant 0 : i32
    %c0_i32_1 = arith.constant 0 : i32
    return %c0_i32, %c0_i32_0 : i32, i32
  }
  func.func @transform_23(%arg0: i32) -> (i32, i32) {
    %c0_i32 = arith.constant 0 : i32
    %c0_i32_0 = arith.constant 0 : i32
    %c0_i32_1 = arith.constant 0 : i32
    return %c0_i32, %c0_i32_0 : i32, i32
  }
  func.func @transform_24(%arg0: i32) -> (i32, i32) {
    %c0_i32 = arith.constant 0 : i32
    %c0_i32_0 = arith.constant 0 : i32
    %c0_i32_1 = arith.constant 0 : i32
    return %c0_i32, %c0_i32_0 : i32, i32
  }
  func.func @transform_25(%arg0: i32) -> (i32, i32) {
    %c0_i32 = arith.constant 0 : i32
    %c0_i32_0 = arith.constant 0 : i32
    %c0_i32_1 = arith.constant 0 : i32
    return %c0_i32, %c0_i32_0 : i32, i32
  }
  func.func @transform_26(%arg0: i32) -> (i32, i32) {
    %c0_i32 = arith.constant 0 : i32
    %c0_i32_0 = arith.constant 0 : i32
    %c0_i32_1 = arith.constant 0 : i32
    return %c0_i32, %c0_i32_0 : i32, i32
  }
}

</mosaic_0001>

<bundles_post_ra>
// kernel: forward.1
= control target key start
LH: loop header
LB: loop body
LE: loop exit
PB: predicated region body
PF: predicated region fallthrough
CT: control target
= control target key end

     0   :  { %s5570_s0 = inlined_call_operand.vmem [shape: f32[8,1188], index: 0, kind: input, shape index: {}]   ;;  %s5571_s1 = inlined_call_operand.vmem [shape: bf16[1188,96], index: 1, kind: input, shape index: {}]   ;;  %s5572_s2 = inlined_call_operand.vmem [shape: f32[1,96], index: 2, kind: input, shape index: {}]   ;;  %s5573_s3 = inlined_call_operand.vmem [shape: f32[5,96], index: 3, kind: input, shape index: {}]   ;;  %s5574_s4 = inlined_call_operand.vmem [shape: f32[2,4,1,96], index: 4, kind: input, shape index: {}]   ;;  %s5575_s5 = inlined_call_operand.vmem [shape: bf16[2,96,288], index: 5, kind: input, shape index: {}]   ;;  %s5576_s6 = inlined_call_operand.vmem [shape: f32[2,1,288], index: 6, kind: input, shape index: {}]   ;;  %s5577_s7 = inlined_call_operand.vmem [shape: bf16[2,96,96], index: 7, kind: input, shape index: {}]   ;;  %s5578_s8 = inlined_call_operand.vmem [shape: f32[2,1,96], index: 8, kind: input, shape index: {}]   ;;  %s5579_s9 = inlined_call_operand.vmem [shape: bf16[2,96,384], index: 9, kind: input, shape index: {}]   ;;  %s5580_s10 = inlined_call_operand.vmem [shape: f32[2,1,384], index: 10, kind: input, shape index: {}]   ;;  %s5581_s11 = inlined_call_operand.vmem [shape: bf16[2,384,96], index: 11, kind: input, shape index: {}]   ;;  %s5582_s12 = inlined_call_operand.vmem [shape: f32[2,1,96], index: 12, kind: input, shape index: {}]   ;;  %s5583_s13 = inlined_call_operand.vmem [shape: bf16[96,64], index: 13, kind: input, shape index: {}]   ;;  %s5584_s14 = inlined_call_operand.vmem [shape: f32[1,64], index: 14, kind: input, shape index: {}]   ;;  %s5585_s15 = inlined_call_operand.vmem [shape: f32[1,64], index: 15, kind: input, shape index: {}]   ;;  %s5586_s16 = inlined_call_operand.<no memory space> [shape: f32[1,1], index: 16, kind: input, shape index: {}]   ;;  %s5587_s17 = inlined_call_operand.vmem [shape: bf16[96,128], index: 17, kind: input, shape index: {}]   ;;  %s5588_s18 = inlined_call_operand.vmem [shape: f32[1,128], index: 18, kind: input, shape index: {}]   ;;  %s5589_s19 = inlined_call_operand.vmem [shape: f32[1,128], index: 19, kind: input, shape index: {}]   ;;  %s5590_s20 = inlined_call_operand.vmem [shape: bf16[128,64], index: 20, kind: input, shape index: {}]   ;;  %s5591_s21 = inlined_call_operand.vmem [shape: f32[1,64], index: 21, kind: input, shape index: {}]   ;;  %s5592_s22 = inlined_call_operand.vmem [shape: bf16[64,2], index: 22, kind: input, shape index: {}]   ;;  %s5593_s23 = inlined_call_operand.vmem [shape: f32[1,2], index: 23, kind: input, shape index: {}]   ;;  %s5594_s24 = inlined_call_operand.hbm [shape: f32[2,2], index: 24, kind: output, shape index: {0}]   ;;  %s5595_s25 = inlined_call_operand.vmem [shape: f32[2,1], index: 25, kind: output, shape index: {1}]   ;;  %s5596_s26 = inlined_call_operand.hbm [shape: f32[2,96], index: 26, kind: output, shape index: {2}]  }
   0x1   :  { %5602 = sst [smem:[#allocation11_spill]] %s5570_s0  ;;  %v32_v0 = vstv %s5586_s16 }
   0x2   :  { %5603 = sst [smem:[#allocation12_spill]] %s5571_s1  ;;  %33 = vst [vmem:[#allocation3] sm:$0x1] %v32_v0 }
   0x3   :  { %5604 = sst [smem:[#allocation13_spill]] %s5572_s2 }
   0x4   :  { %5605 = sst [smem:[#allocation14_spill]] %s5573_s3 }
   0x5   :  { %5606 = sst [smem:[#allocation15_spill]] %s5574_s4 }
   0x6   :  { %5607 = sst [smem:[#allocation16_spill]] %s5575_s5 }
   0x7   :  { %5608 = sst [smem:[#allocation17_spill]] %s5576_s6 }
   0x8   :  { %5609 = sst [smem:[#allocation18_spill]] %s5577_s7 }
   0x9   :  { %5610 = sst [smem:[#allocation19_spill]] %s5578_s8 }
   0xa   :  { %5611 = sst [smem:[#allocation20_spill]] %s5579_s9 }
   0xb   :  { %5612 = sst [smem:[#allocation21_spill]] %s5580_s10 }
   0xc   :  { %5613 = sst [smem:[#allocation22_spill]] %s5584_s14 }
   0xd   :  { %5614 = sst [smem:[#allocation23_spill]] %s5585_s15 }
   0xe   :  { %5615 = sst [smem:[#allocation24_spill]] %s5588_s18 }
   0xf   :  { %5616 = sst [smem:[#allocation25_spill]] %s5589_s19 }
  0x10   :  { %5617 = sst [smem:[#allocation26_spill]] %s5590_s20 }
  0x11   :  { %5618 = sst [smem:[#allocation27_spill]] %s5591_s21 }
  0x12   :  { %5619 = sst [smem:[#allocation28_spill]] %s5592_s22 }
  0x13   :  { %5620 = sst [smem:[#allocation29_spill]] %s5593_s23 }
  0x14   :  { %5621 = sst [smem:[#allocation30_spill]] %s5594_s24 }
  0x15   :  { %5622 = sst [smem:[#allocation31_spill]] %s5595_s25 }
  0x16   :  { %5623 = sst [smem:[#allocation32_spill]] %s5596_s26 }
  0x17   :  { %34 = vsyncpa [#allocation5], 0 }
  0x18   :  { %35 = vsyncpa [#allocation7], 0  ;;  %s4796_s7 = smov 0  }
  0x19 LB: > { %5624 = sst [smem:[#allocation10_spill]] %s4637_s7  ;;  %s4802_s28 = sadd.s32 4294967295, %s4637_s7   ;;  %s4637_s7 = sphi %s4796_s7, %s41_s7  }
  0x1a   : > { %p3576_p0 = scmp.ge.s32.totalorder %s4637_s7, 1  ;;  %p779_p1 = scmp.lt.s32.totalorder %s4637_s7, 3 }
  0x1c   : > { %p780_p2 = pnand %p3576_p0, %p779_p1 }
  0x1d   : > { %p877_p3 = scmp.lt.s32.totalorder (!%p780_p2), %s4802_s28, 1  ;;  %s5625_s9 = sld [smem:[#allocation15_spill]] (!%p780_p2) }
  0x1e   : > { %783 = sbr.rel (%p780_p2) target bundleno = 2983 (0xba7), region = 116  ;;  %s5626_s6 = sld [smem:[#allocation16_spill]] (!%p780_p2) }
  0x1f   : > { %s5627_s26 = sld [smem:[#allocation17_spill]] (!%p780_p2)  ;;  %p3582_p4 = scmp.ne.s32.totalorder (!%p780_p2), %s4802_s28, 0 }
  0x20   : > { %s5628_s19 = sld [smem:[#allocation19_spill]] (!%p780_p2) }
  0x21   : > { %s5630_s5 = sld [smem:[#allocation20_spill]] (!%p780_p2) }
  0x22   : > { %s5631_s15 = sld [smem:[#allocation21_spill]] (!%p780_p2) }
  0x23   : > { %s4808_s16 = scalar_select %p877_p3, %s4802_s28, 1 }
  0x24   : > { %s5633_s14 = sld [smem:[#allocation11_spill]] (!%p3582_p4) }
  0x25   : > { %s3577_s8 = sshll.u32 %s4808_s16, 2  ;;  %s4440_s4 = smul.u32 144, %s4808_s16 }
  0x26   : > { %s4815_s30 = scalar_lea.vmem %s5625_s9, %s3577_s8  ;;  %s4441_s2 = smul.u32 3, %s4808_s16 }
  0x27   : > { %s4821_s1 = scalar_lea.vmem %s5626_s6, %s4440_s4  ;;  %s4442_s27 = smul.u32 48, %s4808_s16 }
  0x28   : > { %s4827_s24 = scalar_lea.vmem %s5627_s26, %s4441_s2  ;;  %s897_s18 = scalar_lea.vmem %s5628_s19, %s4808_s16 }
  0x29   : > { %s5629_s8 = sld [smem:[#allocation18_spill]]  ;;  %s4841_s10 = scalar_lea.vmem %s5630_s5, %s4440_s4 }
  0x2a   : > { %s4846_s7 = scalar_lea.vmem %s5631_s15, %s4441_s2  ;;  %s4443_s26 = smul.u32 192, %s4808_s16 }
  0x2b   : > { %s914_s19 = scalar_lea.vmem %s5582_s12, %s4808_s16  ;;  %919 = sbr.rel (%p3582_p4) target bundleno = 287 (0x11f), region = 120 }
  0x2c   : > { %s4856_s22 = scalar_lea.vmem %s5581_s11, %s4443_s26  ;;  %s5634_s25 = sld [smem:[#allocation13_spill]] (!%p3582_p4) }
  0x2d   : > { %s5635_s15 = sld [smem:[#allocation14_spill]] (!%p3582_p4) }
  0x2f   : > { %s4836_s0 = scalar_lea.vmem %s5629_s8, %s4442_s27  ;;  %s5632_s27 = sld [smem:[#allocation12_spill]] (!%p3582_p4) }
  0x30   : > { %v922_v33 = vld [vmem:[%s5633_s14 + $0x10] sm:$0xff]  ;;  %v920_v34 = vld [vmem:[%s5633_s14] sm:$0xff]  ;;  %v923_v39 = vld [vmem:[%s5633_s14 + $0x18] sm:$0xff]  ;;  %vm1544_vm0 = vcmask 1041408   ;;  %vm1540_vm1 = vcmask 293888   ;;  %vm1694_vm2 = vcmask 1040384  }
  0x31   : > { %v921_v40 = vld [vmem:[%s5633_s14 + $0x8] sm:$0xff]  ;;  %v1081_v41 = vpack.c.bf16 %v922_v33, %v922_v33  ;;  %v1079_v42 = vpack.c.bf16 %v920_v34, %v920_v34  ;;  %v1082_v45 = vpack.c.bf16 %v923_v39, %v923_v39  ;;  %v928_v33 = vld [vmem:[%s5633_s14 + $0x40] sm:$0xff]  ;;  %vm1702_vm3 = vcmask 779264  }
  0x32   : > { %v1080_v46 = vpack.c.bf16 %v921_v40, %v921_v40  ;;  %v1087_v34 = vpack.c.bf16 %v928_v33, %v928_v33  ;;  %vm1696_vm4 = vcmask 1044480   ;;  %vm1698_vm5 = vcmask 1045504  }
  0x33   : > { %vm1700_vm6 = vcmask 785408  }
  0x35   : > { %v4283_v1 = vld [vmem:[%s5632_s27 + $0x38] sm:$0xff]  ;;  %v4282_v5 = vld [vmem:[%s5632_s27 + $0x30] sm:$0xff]  ;;  %v4281_v9 = vld [vmem:[%s5632_s27 + $0x28] sm:$0xff] }
  0x36   : > { %v4299_v2 = vld [vmem:[%s5632_s27 + $0xb8] sm:$0xff]  ;;  %1548 = vmatpush.bf16.msra.mxu0 %v4283_v1  ;;  %v4298_v6 = vld [vmem:[%s5632_s27 + $0xb0] sm:$0xff]  ;;  %v4297_v10 = vld [vmem:[%s5632_s27 + $0xa8] sm:$0xff] }
  0x37   : > { %v4307_v3 = vld [vmem:[%s5632_s27 + $0xf8] sm:$0xff]  ;;  %1574 = vmatpush.bf16.msra.mxu2 %v4299_v2  ;;  %v4306_v7 = vld [vmem:[%s5632_s27 + $0xf0] sm:$0xff]  ;;  %v4305_v11 = vld [vmem:[%s5632_s27 + $0xe8] sm:$0xff] }
  0x38   : > { %v4291_v4 = vld [vmem:[%s5632_s27 + $0x78] sm:$0xff]  ;;  %1587 = vmatpush.bf16.msra.mxu3 %v4307_v3  ;;  %v4290_v8 = vld [vmem:[%s5632_s27 + $0x70] sm:$0xff]  ;;  %v4289_v12 = vld [vmem:[%s5632_s27 + $0x68] sm:$0xff] }
  0x39   : > { %1561 = vmatpush.bf16.msra.mxu1 %v4291_v4  ;;  %v4280_v13 = vld [vmem:[%s5632_s27 + $0x20] sm:$0xff]  ;;  %v4279_v17 = vld [vmem:[%s5632_s27 + $0x18] sm:$0xff]  ;;  %v4278_v21 = vld [vmem:[%s5632_s27 + $0x10] sm:$0xff] }
  0x3a   : > { %1549 = vmatpush.bf16.msra.mxu0 %v4282_v5  ;;  %v4296_v14 = vld [vmem:[%s5632_s27 + $0xa0] sm:$0xff]  ;;  %v4295_v18 = vld [vmem:[%s5632_s27 + $0x98] sm:$0xff]  ;;  %v4294_v22 = vld [vmem:[%s5632_s27 + $0x90] sm:$0xff] }
  0x3b   : > { %1575 = vmatpush.bf16.msra.mxu2 %v4298_v6  ;;  %v4304_v15 = vld [vmem:[%s5632_s27 + $0xe0] sm:$0xff]  ;;  %v4303_v19 = vld [vmem:[%s5632_s27 + $0xd8] sm:$0xff]  ;;  %v4302_v23 = vld [vmem:[%s5632_s27 + $0xd0] sm:$0xff] }
  0x3c   : > { %1588 = vmatpush.bf16.msra.mxu3 %v4306_v7  ;;  %v4288_v16 = vld [vmem:[%s5632_s27 + $0x60] sm:$0xff]  ;;  %v4287_v20 = vld [vmem:[%s5632_s27 + $0x58] sm:$0xff]  ;;  %v4286_v24 = vld [vmem:[%s5632_s27 + $0x50] sm:$0xff] }
  0x3d   : > { %1562 = vmatpush.bf16.msra.mxu1 %v4290_v8  ;;  %v4277_v25 = vld [vmem:[%s5632_s27 + $0x8] sm:$0xff]  ;;  %v4276_v29 = vld [vmem:[%s5632_s27] sm:$0xff]  ;;  %v4315_v30 = vld [vmem:[%s5632_s27 + $0x138] sm:$0xff] }
  0x3e   : > { %1550 = vmatpush.bf16.msra.mxu0 %v4281_v9  ;;  %v4293_v26 = vld [vmem:[%s5632_s27 + $0x88] sm:$0xff]  ;;  %v4292_v31 = vld [vmem:[%s5632_s27 + $0x80] sm:$0xff]  ;;  %v4331_v32 = vld [vmem:[%s5632_s27 + $0x1b8] sm:$0xff] }
  0x3f   : > { %1576 = vmatpush.bf16.msra.mxu2 %v4297_v10  ;;  %v4301_v27 = vld [vmem:[%s5632_s27 + $0xc8] sm:$0xff]  ;;  %v4300_v35 = vld [vmem:[%s5632_s27 + $0xc0] sm:$0xff]  ;;  %v4339_v36 = vld [vmem:[%s5632_s27 + $0x1f8] sm:$0xff] }
  0x40   : > { %1589 = vmatpush.bf16.msra.mxu3 %v4305_v11  ;;  %v4285_v28 = vld [vmem:[%s5632_s27 + $0x48] sm:$0xff]  ;;  %v4284_v37 = vld [vmem:[%s5632_s27 + $0x40] sm:$0xff]  ;;  %v4323_v38 = vld [vmem:[%s5632_s27 + $0x178] sm:$0xff] }
  0x41   : > { %1563 = vmatpush.bf16.msra.mxu1 %v4289_v12  ;;  %v4314_v43 = vld [vmem:[%s5632_s27 + $0x130] sm:$0xff]  ;;  %v4313_v49 = vld [vmem:[%s5632_s27 + $0x128] sm:$0xff]  ;;  %v4312_v53 = vld [vmem:[%s5632_s27 + $0x120] sm:$0xff] }
  0x42   : > { %1551 = vmatpush.bf16.msra.mxu0 %v4280_v13  ;;  %v4330_v44 = vld [vmem:[%s5632_s27 + $0x1b0] sm:$0xff]  ;;  %v4329_v50 = vld [vmem:[%s5632_s27 + $0x1a8] sm:$0xff]  ;;  %v4328_v54 = vld [vmem:[%s5632_s27 + $0x1a0] sm:$0xff] }
  0x43   : > { %1577 = vmatpush.bf16.msra.mxu2 %v4296_v14  ;;  %v4338_v47 = vld [vmem:[%s5632_s27 + $0x1f0] sm:$0xff]  ;;  %v4337_v51 = vld [vmem:[%s5632_s27 + $0x1e8] sm:$0xff]  ;;  %v4336_v55 = vld [vmem:[%s5632_s27 + $0x1e0] sm:$0xff] }
  0x44   : > { %1590 = vmatpush.bf16.msra.mxu3 %v4304_v15  ;;  %v4322_v48 = vld [vmem:[%s5632_s27 + $0x170] sm:$0xff]  ;;  %v4321_v52 = vld [vmem:[%s5632_s27 + $0x168] sm:$0xff]  ;;  %v4320_v56 = vld [vmem:[%s5632_s27 + $0x160] sm:$0xff] }
  0x45   : > { %1564 = vmatpush.bf16.msra.mxu1 %v4288_v16  ;;  %v4311_v57 = vld [vmem:[%s5632_s27 + $0x118] sm:$0xff]  ;;  %v4310_v61 = vld [vmem:[%s5632_s27 + $0x110] sm:$0xff]  ;;  %v4309_v2 = vld [vmem:[%s5632_s27 + $0x108] sm:$0xff] }
  0x46   : > { %1552 = vmatpush.bf16.msra.mxu0 %v4279_v17  ;;  %v4327_v58 = vld [vmem:[%s5632_s27 + $0x198] sm:$0xff]  ;;  %v4326_v62 = vld [vmem:[%s5632_s27 + $0x190] sm:$0xff]  ;;  %v4325_v3 = vld [vmem:[%s5632_s27 + $0x188] sm:$0xff] }
  0x47   : > { %1578 = vmatpush.bf16.msra.mxu2 %v4295_v18  ;;  %v4335_v59 = vld [vmem:[%s5632_s27 + $0x1d8] sm:$0xff]  ;;  %v4334_v63 = vld [vmem:[%s5632_s27 + $0x1d0] sm:$0xff]  ;;  %v4333_v5 = vld [vmem:[%s5632_s27 + $0x1c8] sm:$0xff] }
  0x48   : > { %1591 = vmatpush.bf16.msra.mxu3 %v4303_v19  ;;  %v4319_v60 = vld [vmem:[%s5632_s27 + $0x158] sm:$0xff]  ;;  %v4318_v0 = vld [vmem:[%s5632_s27 + $0x150] sm:$0xff]  ;;  %v4317_v6 = vld [vmem:[%s5632_s27 + $0x148] sm:$0xff] }
  0x49   : > { %1565 = vmatpush.bf16.msra.mxu1 %v4287_v20  ;;  %v1078_v1 = vld [vmem:[%s5632_s27 + $0x250] sm:$0x3]  ;;  %v4308_v7 = vld [vmem:[%s5632_s27 + $0x100] sm:$0xff]  ;;  %v4347_v11 = vld [vmem:[%s5632_s27 + $0x238] sm:$0xff] }
  0x4a   : > { %1553 = vmatpush.bf16.msra.mxu0 %v4278_v21  ;;  %v1390_v4 = vunpack.c.l.b16 %v1078_v1  ;;  %v4324_v8 = vld [vmem:[%s5632_s27 + $0x180] sm:$0xff]  ;;  %v926_v9 = vld [vmem:[%s5633_s14 + $0x30] sm:$0xff]  ;;  %v927_v15 = vld [vmem:[%s5633_s14 + $0x38] sm:$0xff] }
  0x4b   : > { %1579 = vmatpush.bf16.msra.mxu2 %v4294_v22  ;;  %v924_v10 = vld [vmem:[%s5633_s14 + $0x20] sm:$0xff]  ;;  %v1085_v16 = vpack.c.bf16 %v926_v9, %v926_v9  ;;  %v925_v18 = vld [vmem:[%s5633_s14 + $0x28] sm:$0xff]  ;;  %v4346_v19 = vld [vmem:[%s5632_s27 + $0x230] sm:$0xff]  ;;  %v1086_v20 = vpack.c.bf16 %v927_v15, %v927_v15 }
  0x4c   : > { %1592 = vmatpush.bf16.msra.mxu3 %v4302_v23  ;;  %v1465_v12 = vpack.c.b16 %v1390_v4, %v1390_v4  ;;  %v4332_v13 = vld [vmem:[%s5632_s27 + $0x1c0] sm:$0xff]  ;;  %v1083_v17 = vpack.c.bf16 %v924_v10, %v924_v10  ;;  %v1084_v22 = vpack.c.bf16 %v925_v18, %v925_v18  ;;  %v4349_v23 = vld [vmem:[%s5632_s27 + $0x248] sm:$0xff] }
  0x4d   : > { %1566 = vmatpush.bf16.msra.mxu1 %v4286_v24  ;;  %v4316_v14 = vld [vmem:[%s5632_s27 + $0x140] sm:$0xff]  ;;  %v4345_v24 = vld [vmem:[%s5632_s27 + $0x228] sm:$0xff] }
  0x4e   : > { %1554 = vmatpush.bf16.msra.mxu0 %v4277_v25  ;;  %v1546_v21 = vsel %vm1544_vm0, %v1465_v12, 0  ;;  %v4348_v25 = vld [vmem:[%s5632_s27 + $0x240] sm:$0xff] }
  0x4f   : > { %1580 = vmatpush.bf16.msra.mxu2 %v4293_v26  ;;  %v4344_v26 = vld [vmem:[%s5632_s27 + $0x220] sm:$0xff] }
  0x50   : > { %1593 = vmatpush.bf16.msra.mxu3 %v4301_v27  ;;  %v4343_v27 = vld [vmem:[%s5632_s27 + $0x218] sm:$0xff] }
  0x51   : > { %1567 = vmatpush.bf16.msra.mxu1 %v4285_v28  ;;  %v929_v28 = vld [vmem:[%s5633_s14 + $0x48] sm:$0xff] }
  0x52   : > { %1555 = vmatpush.bf16.msra.mxu0 %v4276_v29  ;;  %v4342_v29 = vld [vmem:[%s5632_s27 + $0x210] sm:$0xff] }
  0x53   : > { %1581 = vmatpush.bf16.msra.mxu2 %v4292_v31  ;;  %v4341_v31 = vld [vmem:[%s5632_s27 + $0x208] sm:$0xff] }
  0x54   : > { %1594 = vmatpush.bf16.msra.mxu3 %v4300_v35 }
  0x55   : > { %1568 = vmatpush.bf16.msra.mxu1 %v4284_v37  ;;  %1556 = vmatmul.bf16.vlgmr.msra.gmra.mxu0 %v1079_v42 }
  0x56   : > { %1600 = vmatpush.bf16.msrb.mxu0 %v4315_v30  ;;  %1582 = vmatmul.bf16.vlgmr.msra.gmra.mxu2 %v1081_v41  ;;  %v1088_v30 = vpack.c.bf16 %v929_v28, %v929_v28 }
  0x57   : > { %1626 = vmatpush.bf16.msrb.mxu2 %v4331_v32  ;;  %1595 = vmatmul.bf16.vlgmr.msra.gmra.mxu3 %v1082_v45  ;;  %v4340_v32 = vld [vmem:[%s5632_s27 + $0x200] sm:$0xff] }
  0x58   : > { %1639 = vmatpush.bf16.msrb.mxu3 %v4339_v36  ;;  %1569 = vmatmul.bf16.vlgmr.msra.gmra.mxu1 %v1080_v46 }
  0x59   : > { %1613 = vmatpush.bf16.msrb.mxu1 %v4323_v38 }
  0x5a   : > { %1601 = vmatpush.bf16.msrb.mxu0 %v4314_v43  ;;  %v4483_v43 = vld [vmem:[%s5634_s25] ss:$0 sm:$0xff] }
  0x5b   : > { %1627 = vmatpush.bf16.msrb.mxu2 %v4330_v44 }
  0x5c   : > { %1640 = vmatpush.bf16.msrb.mxu3 %v4338_v47 }
  0x5d   : > { %1614 = vmatpush.bf16.msrb.mxu1 %v4322_v48 }
  0x5e   : > { %1602 = vmatpush.bf16.msrb.mxu0 %v4313_v49 }
  0x5f   : > { %1628 = vmatpush.bf16.msrb.mxu2 %v4329_v50 }
  0x60   : > { %1641 = vmatpush.bf16.msrb.mxu3 %v4337_v51 }
  0x61   : > { %1615 = vmatpush.bf16.msrb.mxu1 %v4321_v52 }
  0x62   : > { %1603 = vmatpush.bf16.msrb.mxu0 %v4312_v53 }
  0x63   : > { %1629 = vmatpush.bf16.msrb.mxu2 %v4328_v54 }
  0x64   : > { %1642 = vmatpush.bf16.msrb.mxu3 %v4336_v55 }
  0x65   : > { %1616 = vmatpush.bf16.msrb.mxu1 %v4320_v56 }
  0x66   : > { %1604 = vmatpush.bf16.msrb.mxu0 %v4311_v57 }
  0x67   : > { %1630 = vmatpush.bf16.msrb.mxu2 %v4327_v58 }
  0x68   : > { %1643 = vmatpush.bf16.msrb.mxu3 %v4335_v59 }
  0x69   : > { %1617 = vmatpush.bf16.msrb.mxu1 %v4319_v60  ;;  %v1678_v60 = vld [vmem:[%s5635_s15] sm:$0x1f] }
  0x6a   : > { %1605 = vmatpush.bf16.msrb.mxu0 %v4310_v61  ;;  %v1680_v1 = vrot.slane %v1678_v60, 1 }
  0x6b   : > { %1631 = vmatpush.bf16.msrb.mxu2 %v4326_v62 }
  0x6c   : > { %1644 = vmatpush.bf16.msrb.mxu3 %v4334_v63 }
  0x6d   : > { %1618 = vmatpush.bf16.msrb.mxu1 %v4318_v0 }
  0x6e   : > { %1606 = vmatpush.bf16.msrb.mxu0 %v4309_v2  ;;  %v1683_v2 = vrot.slane %v1678_v60, 5 }
  0x6f   : > { %1632 = vmatpush.bf16.msrb.mxu2 %v4325_v3 }
  0x70   : > { %1645 = vmatpush.bf16.msrb.mxu3 %v4333_v5 }
  0x71   : > { %1619 = vmatpush.bf16.msrb.mxu1 %v4317_v6  ;;  %v1689_v6 = vrot.slane %v1678_v60, 3 }
  0x72   : > { %1607 = vmatpush.bf16.msrb.mxu0 %v4308_v7 }
  0x73   : > { %1633 = vmatpush.bf16.msrb.mxu2 %v4324_v8 }
  0x74   : > { %1646 = vmatpush.bf16.msrb.mxu3 %v4332_v13 }
  0x75   : > { %1620 = vmatpush.bf16.msrb.mxu1 %v4316_v14  ;;  %1608 = vmatmul.bf16.vlgmr.msrb.gmra.mxu0 %v1083_v17 }
  0x76   : > { %1652 = vmatpush.bf16.msra.mxu0 %v4347_v11  ;;  %1634 = vmatmul.bf16.vlgmr.msrb.gmra.mxu2 %v1085_v16 }
  0x77   : > { %1647 = vmatmul.bf16.vlgmr.msrb.gmra.mxu3 %v1086_v20 }
  0x78   : > { %1621 = vmatmul.bf16.vlgmr.msrb.gmra.mxu1 %v1084_v22 }
  0x79   : > { %1670 = vmatpush.bf16.msra.mxu1 %v1546_v21 }
  0x7a   : > { %1653 = vmatpush.bf16.msra.mxu0 %v4346_v19 }
  0x7d   : > { %1671 = vmatpush.bf16.msra.mxu1 %v4349_v23 }
  0x7e   : > { %1654 = vmatpush.bf16.msra.mxu0 %v4345_v24 }
  0x81   : > { %1672 = vmatpush.bf16.msra.mxu1 %v4348_v25 }
  0x82   : > { %1655 = vmatpush.bf16.msra.mxu0 %v4344_v26 }
  0x86   : > { %1656 = vmatpush.bf16.msra.mxu0 %v4343_v27 }
  0x88   : > { %3879 = vmatmul.msk.bf16.vlgmr.msra.gmra.mxu1 %vm1540_vm1, %v1088_v30 }
  0x8a   : > { %1657 = vmatpush.bf16.msra.mxu0 %v4342_v29 }
  0x8e   : > { %1658 = vmatpush.bf16.msra.mxu0 %v4341_v31 }
  0x92   : > { %1659 = vmatpush.bf16.msra.mxu0 %v4340_v32 }
  0x95   : > { %1660 = vmatmul.bf16.vlgmr.msra.gmra.mxu0 %v1087_v34 }
  0xd2   : > { %v1557_v35 = vpop.f32.mrf.mxu0 }
  0xd3   : > { %v1558_v44 = vadd.f32 %v4483_v43, %v1557_v35 }
  0xd5   : > { %v1570_v36 = vpop.f32.mrf.mxu1 }
  0xd6   : > { %v1571_v47 = vadd.f32 %v1570_v36, %v1558_v44 }
  0xd9   : > { %v1583_v37 = vpop.f32.mrf.mxu2 }
  0xda   : > { %v1596_v38 = vpop.f32.mrf.mxu3  ;;  %v1559_v39 = vpop.f32.mrf.mxu0  ;;  %v1584_v49 = vadd.f32 %v1583_v37, %v1571_v47 }
  0xdc   : > { %v1597_v53 = vadd.f32 %v1596_v38, %v1584_v49 }
  0xdd   : > { %v1572_v40 = vpop.f32.mrf.mxu1 }
  0xe1   : > { %v1585_v41 = vpop.f32.mrf.mxu2 }
  0xe2   : > { %v1598_v42 = vpop.f32.mrf.mxu3 }
  0xf2   : > { %v1609_v45 = vpop.f32.mrf.mxu0 }
  0xf3   : > { %v1610_v55 = vadd.f32 %v1609_v45, %v1597_v53 }
  0xf5   : > { %v1622_v46 = vpop.f32.mrf.mxu1 }
  0xf6   : > { %v1623_v58 = vadd.f32 %v1622_v46, %v1610_v55 }
  0xf9   : > { %v1635_v48 = vpop.f32.mrf.mxu2 }
  0xfa   : > { %v1648_v50 = vpop.f32.mrf.mxu3  ;;  %v1611_v51 = vpop.f32.mrf.mxu0  ;;  %v1636_v59 = vadd.f32 %v1635_v48, %v1623_v58 }
  0xfc   : > { %v1649_v62 = vadd.f32 %v1648_v50, %v1636_v59 }
  0xfd   : > { %v1624_v52 = vpop.f32.mrf.mxu1 }
 0x101   : > { %v1637_v54 = vpop.f32.mrf.mxu2 }
 0x102   : > { %v1650_v56 = vpop.f32.mrf.mxu3 }
 0x105   : > { %v1674_v57 = vpop.f32.mrf.mxu1 }
 0x10d   : > { %v1676_v61 = vpop.f32.mrf.mxu1 }
 0x112   : > { %v1661_v63 = vpop.f32.mrf.mxu0 }
 0x113   : > { %v1662_v0 = vadd.f32 %v1661_v63, %v1649_v62 }
 0x115   : > { %v1675_v3 = vadd.f32 %v1674_v57, %v1662_v0 }
 0x117   : > { %v1682_v4 = vadd.f32 %v1680_v1, %v1675_v3  ;;  %v1685_v5 = vadd.f32 %v1683_v2, %v1675_v3 }
 0x119   : > { %v1687_v7 = vrot.slane %v1682_v4, 7  ;;  %v1692_v8 = vrot.slane %v1685_v5, 6 }
 0x11a   : > { %v1663_v9 = vpop.f32.mrf.mxu0 }
 0x11b   : > { %v1695_v10 = vsel %vm1694_vm2, %v1678_v60, %v1687_v7  ;;  %1703 = vst.msk [vmem:[#allocation2 + $0x8] sm:$0x3] %vm1702_vm3, %v1692_v8 }
 0x11c   : > { %v1697_v11 = vsel %vm1696_vm4, %v1695_v10, %v1689_v6 }
 0x11d   : > { %v1699_v12 = vsel %vm1698_vm5, %v1697_v11, %v1692_v8 }
 0x11e   : > { %1701 = vst.msk [vmem:[#allocation2] sm:$0xff] %vm1700_vm6, %v1699_v12 }
 0x11f PF: > { %vm1713_vm7 = vcmask 785408   ;;  %vm1717_vm8 = vcmask 779264   ;;  %v4639_v17 = vmov 96.0   ;;  %v3945_v34 = vld [vmem:[%s4821_s1 + $0x78] sm:$0xf]  ;;  %s4641_s2 = smov 8  }
 0x120   : > { %4505 = vrcp.f32 %v4639_v17  ;;  %v4366_v35 = vld [vmem:[%s4821_s1 + $0x80] sm:$0xf0]  ;;  %v4365_v36 = vld [vmem:[%s4821_s1 + $0x7c] sm:$0xf]  ;;  %v3947_v38 = vld [vmem:[%s4821_s1 + $0x84] sm:$0xf0] }
 0x121   : > { %v3946_v37 = vor.u32 %v4366_v35, %v3945_v34  ;;  %v3953_v39 = vld [vmem:[%s4821_s1 + $0x80] sm:$0xf]  ;;  %v4367_v40 = vld [vmem:[%s4821_s1 + $0x88] sm:$0xf0]  ;;  %v3950_v41 = vor.u32 %v4365_v36, %v3947_v38  ;;  %v4362_v45 = vld [vmem:[%s4821_s1 + $0x64] sm:$0xf] }
 0x122   : > { %v5124_v15 = vld [vmem:[#allocation2 + $0x8] sm:$0x3]  ;;  %v3954_v42 = vor.u32 %v4367_v40, %v3953_v39  ;;  %v3933_v43 = vld [vmem:[%s4821_s1 + $0x60] sm:$0xf]  ;;  %v4363_v44 = vld [vmem:[%s4821_s1 + $0x68] sm:$0xf0] }
 0x123   : > { %v1718_v16 = vsel %vm1717_vm8, %v5124_v15, 0.0  ;;  %1910 = vmatpush.bf16.msra.mxu0 %v3946_v37  ;;  %1924 = vmatpush.bf16.msra.mxu1 %v3950_v41  ;;  %v3934_v46 = vor.u32 %v4363_v44, %v3933_v43  ;;  %v3935_v47 = vld [vmem:[%s4821_s1 + $0x6c] sm:$0xf0]  ;;  %v3941_v48 = vld [vmem:[%s4821_s1 + $0x68] sm:$0xf]  ;;  %s4642_s29 = smov 32  }
 0x124   : > { %1938 = vmatpush.bf16.msra.mxu2 %v3954_v42  ;;  %v4364_v49 = vld [vmem:[%s4821_s1 + $0x70] sm:$0xf0]  ;;  %v3938_v50 = vor.u32 %v4362_v45, %v3935_v47  ;;  %v3921_v52 = vld [vmem:[%s4821_s1 + $0x48] sm:$0xf]  ;;  %v4359_v54 = vld [vmem:[%s4821_s1 + $0x4c] sm:$0xf] }
 0x125   : > { %v5120_v13 = vld [vmem:[#allocation2] sm:$0xff]  ;;  %v3942_v51 = vor.u32 %v4364_v49, %v3941_v48  ;;  %v4360_v53 = vld [vmem:[%s4821_s1 + $0x50] sm:$0xf0]  ;;  %v3923_v56 = vld [vmem:[%s4821_s1 + $0x54] sm:$0xf0]  ;;  %s4644_s8 = smov 80  }
 0x126   : > { %v1714_v14 = vsel %vm1713_vm7, %v5120_v13, 0.0  ;;  %v4506_v18 = vpop.eup %4505  ;;  %v3922_v55 = vor.u32 %v4360_v53, %v3921_v52  ;;  %v3929_v57 = vld [vmem:[%s4821_s1 + $0x50] sm:$0xf]  ;;  %v4361_v58 = vld [vmem:[%s4821_s1 + $0x58] sm:$0xf0]  ;;  %v3926_v59 = vor.u32 %v4359_v54, %v3923_v56  ;;  %s4645_s9 = smov 56  }
 0x127   : > { %1715 = vadd.xlane.f32.xlu0 %v1714_v14  ;;  %v1722_v19 = vmul.f32 96.0, %v4506_v18  ;;  %vm1726_vm9 = vweird.f32 %v4506_v18  ;;  %1911 = vmatpush.bf16.msra.mxu0 %v3934_v46  ;;  %v3930_v60 = vor.u32 %v4361_v58, %v3929_v57  ;;  %v3909_v61 = vld [vmem:[%s4821_s1 + $0x30] sm:$0xf]  ;;  %v4357_v62 = vld [vmem:[%s4821_s1 + $0x38] sm:$0xf0]  ;;  %s4646_s5 = smov 88  }
 0x128   : > { %1925 = vmatpush.bf16.msra.mxu1 %v3938_v50  ;;  %1939 = vmatpush.bf16.msra.mxu2 %v3942_v51  ;;  %v4356_v63 = vld [vmem:[%s4821_s1 + $0x34] sm:$0xf]  ;;  %v3910_v0 = vor.u32 %v4357_v62, %v3909_v61  ;;  %v3911_v1 = vld [vmem:[%s4821_s1 + $0x3c] sm:$0xf0]  ;;  %v3917_v2 = vld [vmem:[%s4821_s1 + $0x38] sm:$0xf] }
 0x129   : > { %v1723_v20 = vsub.f32 1.0, %v1722_v19  ;;  %v4358_v3 = vld [vmem:[%s4821_s1 + $0x40] sm:$0xf0]  ;;  %v3914_v4 = vor.u32 %v4356_v63, %v3911_v1  ;;  %v3897_v6 = vld [vmem:[%s4821_s1 + $0x18] sm:$0xf]  ;;  %s4647_s6 = smov 40  }
 0x12a   : > { %v3918_v5 = vor.u32 %v4358_v3, %v3917_v2  ;;  %v4354_v7 = vld [vmem:[%s4821_s1 + $0x20] sm:$0xf0]  ;;  %v4353_v8 = vld [vmem:[%s4821_s1 + $0x1c] sm:$0xf]  ;;  %v3899_v10 = vld [vmem:[%s4821_s1 + $0x24] sm:$0xf0] }
 0x12b   : > { %v1724_v21 = vmul.f32 %v4506_v18, %v1723_v20  ;;  %1912 = vmatpush.bf16.msra.mxu0 %v3922_v55  ;;  %v3898_v9 = vor.u32 %v4354_v7, %v3897_v6  ;;  %v3905_v11 = vld [vmem:[%s4821_s1 + $0x20] sm:$0xf]  ;;  %v4355_v12 = vld [vmem:[%s4821_s1 + $0x28] sm:$0xf0]  ;;  %v3902_v14 = vor.u32 %v4353_v8, %v3899_v10  ;;  %v4350_v19 = vld [vmem:[%s4821_s1 + $0x4] sm:$0xf] }
 0x12c   : > { %1926 = vmatpush.bf16.msra.mxu1 %v3926_v59  ;;  %1940 = vmatpush.bf16.msra.mxu2 %v3930_v60  ;;  %v3885_v17 = vld [vmem:[%s4821_s1] sm:$0xf]  ;;  %s4648_s26 = smov 64   ;;  %s4649_s3 = smov 16   ;;  %vm1954_vm0 = vcmask 195584   ;;  %vm2022_vm1 = vcmask 64512  }
 0x12d   : > { %v1725_v22 = vadd.f32 %v4506_v18, %v1724_v21  ;;  %v4499_v48 = vld [vmem:[%s4815_s30] ss:$0 sm:$0xff]  ;;  %v4500_v53 = vld [vmem:[%s4815_s30 + $0x1] ss:$0 sm:$0xff]  ;;  %vm1996_vm2 = vcmask 1041408   ;;  %vm1997_vm3 = vcmask 1042432  }
 0x12e   : > { %vm1975_vm4 = vcmask 36864   ;;  %s4651_s21 = smov 120   ;;  %vm2119_vm5 = vcmask 130048   ;;  %vm1992_vm6 = vcmask 39936   ;;  %s4652_s23 = smov 24  }
 0x12f   : > { %1719 = vadd.xlane.f32.xlu0 %v1718_v16  ;;  %v5128_v23 = vsel %vm1726_vm9, %v4506_v18, %v1725_v22  ;;  %1913 = vmatpush.bf16.msra.mxu0 %v3910_v0  ;;  %v3906_v16 = vor.u32 %v4355_v12, %v3905_v11  ;;  %v4351_v18 = vld [vmem:[%s4821_s1 + $0x8] sm:$0xf0]  ;;  %v3887_v22 = vld [vmem:[%s4821_s1 + $0xc] sm:$0xf0]  ;;  %s4653_s25 = smov 48   ;;  %s4654_s4 = smov 72  }
 0x130   : > { %1927 = vmatpush.bf16.msra.mxu1 %v3914_v4  ;;  %1941 = vmatpush.bf16.msra.mxu2 %v3918_v5  ;;  %v3886_v21 = vor.u32 %v4351_v18, %v3885_v17  ;;  %vm2210_vm9 = vcmask 392192   ;;  %p4170_p5 = scmp.ne.s32.totalorder %s4802_s28, 1 }
 0x131   : > { %s5640_s15 = sld [smem:[#allocation31_spill]] (!%p4170_p5) }
 0x132   : > { %s5644_s20 = sld [smem:[#allocation27_spill]] (!%p4170_p5) }
 0x133   : > { %1914 = vmatpush.bf16.msra.mxu0 %v3898_v9 }
 0x134   : > { %1928 = vmatpush.bf16.msra.mxu1 %v3902_v14  ;;  %1942 = vmatpush.bf16.msra.mxu2 %v3906_v16 }
 0x137   : > { %1915 = vmatpush.bf16.msra.mxu0 %v3886_v21 }
 0x19a   : > { %v1716_v24 = vpop.xlane.xlu0 %1715 }
 0x19b   : > { %v1728_v25 = vmul.f32 %v5128_v23, %v1716_v24  ;;  %v3893_v24 = vld [vmem:[%s4821_s1 + $0x8] sm:$0xf] }
 0x19d   : > { %v5132_v26 = vsub.f32 %v5120_v13, %v1728_v25  ;;  %v4352_v25 = vld [vmem:[%s4821_s1 + $0x10] sm:$0xf0]  ;;  %s4640_s1 = smov 112  }
 0x19f   : > { %v1732_v27 = vmul.f32 %v5132_v26, %v5132_v26 }
 0x1a1   : > { %v1734_v28 = vsel %vm1713_vm7, %v1732_v27, 0.0 }
 0x1a2   : > { %1735 = vadd.xlane.f32.xlu1 %v1734_v28  ;;  %v1720_v29 = vpop.xlane.xlu0 %1719  ;;  %v3890_v28 = vor.u32 %v4350_v19, %v3887_v22 }
 0x1a3   : > { %v1729_v30 = vmul.f32 %v5128_v23, %v1720_v29  ;;  %v3894_v29 = vor.u32 %v4352_v25, %v3893_v24 }
 0x1a4   : > { %1929 = vmatpush.bf16.msra.mxu1 %v3890_v28 }
 0x1a5   : > { %v5139_v31 = vsub.f32 %v5124_v15, %v1729_v30  ;;  %1943 = vmatpush.bf16.msra.mxu2 %v3894_v29 }
 0x1a7   : > { %v1733_v32 = vmul.f32 %v5139_v31, %v5139_v31 }
 0x1a9   : > { %v1737_v33 = vsel %vm1717_vm8, %v1733_v32, 0.0 }
 0x1aa   : > { %1738 = vadd.xlane.f32.xlu1 %v1737_v33 }
 0x215   : > { %v1736_v20 = vpop.xlane.xlu1 %1735 }
 0x216   : > { %v1740_v27 = vmul.f32 %v1736_v20, %v5128_v23 }
 0x218   : > { %v1742_v30 = vadd.f32 1e-12, %v1740_v27 }
 0x21a   : > { %4507 = vrsqrt.f32 %v1742_v30  ;;  %vm1750_vm11 = vweird.f32 %v1742_v30 }
 0x21d   : > { %v1739_v32 = vpop.xlane.xlu1 %1738 }
 0x21e   : > { %v1741_v33 = vmul.f32 %v1739_v32, %v5128_v23 }
 0x220   : > { %v4508_v34 = vpop.eup %4507  ;;  %v1743_v35 = vadd.f32 1e-12, %v1741_v33 }
 0x221   : > { %v1745_v36 = vmul.f32 %v4508_v34, %v1742_v30  ;;  %vm1751_vm10 = vweird.f32 %v4508_v34 }
 0x222   : > { %4509 = vrsqrt.f32 %v1743_v35  ;;  %vm1752_vm12 = vmor %vm1750_vm11, %vm1751_vm10  ;;  %vm1760_vm14 = vweird.f32 %v1743_v35  ;;  %vm2212_vm10 = vcmask 588800   ;;  %vm2491_vm11 = vcmask 1044480  }
 0x223   : > { %v1746_v37 = vmul.f32 %v4508_v34, %v1745_v36 }
 0x225   : > { %v1747_v38 = vmul.f32 0.5, %v1746_v37 }
 0x227   : > { %v1748_v39 = vsub.f32 1.5, %v1747_v38 }
 0x228   : > { %v4510_v40 = vpop.eup %4509 }
 0x229   : > { %v1749_v41 = vmul.f32 %v4508_v34, %v1748_v39  ;;  %v1755_v42 = vmul.f32 %v4510_v40, %v1743_v35  ;;  %vm1761_vm13 = vweird.f32 %v4510_v40 }
 0x22a   : > { %vm1762_vm15 = vmor %vm1760_vm14, %vm1761_vm13 }
 0x22b   : > { %v1756_v43 = vmul.f32 %v4510_v40, %v1755_v42  ;;  %v1753_v44 = vsel %vm1752_vm12, %v4508_v34, %v1749_v41 }
 0x22c   : > { %v1764_v47 = vmul.f32 %v1753_v44, %v5132_v26  ;;  %v1801_v26 = vld [vmem:[%s4827_s24] sm:$0x7]  ;;  %s4643_s24 = smov 104  }
 0x22d   : > { %v1757_v45 = vmul.f32 0.5, %v1756_v43  ;;  %v1803_v58 = vperm.slane %v1801_v26, 0  ;;  %v1804_v59 = vperm.slane %v1801_v26, 1  ;;  %v1805_v7 = vperm.slane %v1801_v26, 2 }
 0x22e   : > { %v1769_v52 = vmul.f32 %v4499_v48, %v1764_v47 }
 0x22f   : > { %v1758_v46 = vsub.f32 1.5, %v1757_v45 }
 0x230   : > { %v1774_v55 = vadd.f32 %v4500_v53, %v1769_v52 }
 0x231   : > { %v1759_v49 = vmul.f32 %v4510_v40, %v1758_v46 }
 0x233   : > { %v1763_v50 = vsel %vm1762_vm15, %v4510_v40, %v1759_v49 }
 0x234   : > { %v1765_v51 = vmul.f32 %v1763_v50, %v5139_v31 }
 0x236   : > { %v1770_v54 = vmul.f32 %v4499_v48, %v1765_v51 }
 0x238   : > { %v1775_v56 = vadd.f32 %v4500_v53, %v1770_v54  ;;  %v4650_v53 = vmov 65535  }
 0x239   : > { %v1998_v54 = vsel %vm1996_vm2, 4294967295, %v4650_v53 }
 0x23a   : > { %v1800_v57 = vpack.c.bf16 %v1775_v56, %v1774_v55  ;;  %v5225_v56 = vsel %vm1997_vm3, %v1998_v54, 0 }
 0x23c   : > { %3955 = vmatmul.msk.bf16.vlgmr.msra.gmra.mxu0 %vm1713_vm7, %v1800_v57  ;;  %3956 = vmatmul.msk.bf16.vlgmr.msra.gmra.mxu1 %vm1713_vm7, %v1800_v57 }
 0x23d   : > { %3957 = vmatmul.msk.bf16.vlgmr.msra.gmra.mxu2 %vm1713_vm7, %v1800_v57 }
 0x2b9   : > { %v1917_v60 = vpop.f32.mrf.mxu0  ;;  %v1931_v61 = vpop.f32.mrf.mxu1 }
 0x2ba   : > { %v1918_v62 = vadd.f32 %v1917_v60, %v1803_v58  ;;  %v1932_v63 = vadd.f32 %v1931_v61, %v1804_v59 }
 0x2bc   : > { %v1950_v31 = vpack.c.bf16 %v1918_v62, %v1918_v62  ;;  %v1988_v0 = vpack.c.bf16 %v1932_v63, %v1932_v63 }
 0x2be   : > { %2079 = vrot.lane.b32.xlu1 %v1988_v0, %s4640_s1  ;;  %2020 = vrot.lane.b32.xlu0 %v1988_v0, %s4641_s2 }
 0x2bf   : > { %1952 = vrot.lane.b32.xlu2 %v1950_v31, %s4642_s29 }
 0x2c0   : > { %v1945_v1 = vpop.f32.mrf.mxu2 }
 0x2c1   : > { %v1919_v2 = vpop.f32.mrf.mxu0  ;;  %v1933_v3 = vpop.f32.mrf.mxu1  ;;  %v5193_v16 = vadd.f32 %v1945_v1, %v1805_v7 }
 0x2c2   : > { %v1920_v4 = vadd.f32 %v1919_v2, %v1803_v58  ;;  %v1934_v5 = vadd.f32 %v1933_v3, %v1804_v59 }
 0x2c4   : > { %v2214_v6 = vpack.c.bf16 %v1920_v4, %v1918_v62  ;;  %v2257_v10 = vpack.c.bf16 %v1934_v5, %v1932_v63 }
 0x2c6   : > { %v2216_v8 = vshrl.u32 %v2214_v6, 16  ;;  %v2219_v9 = vshll.u32 %v2214_v6, 16  ;;  %v2259_v19 = vshrl.u32 %v2257_v10, 16  ;;  %v2262_v20 = vshll.u32 %v2257_v10, 16 }
 0x2c7   : > { %2018 = vrot.lane.b32.xlu2 %v1950_v31, %s4641_s2 }
 0x2c8   : > { %v2218_v11 = vrot.slane %v2216_v8, 2  ;;  %v2221_v12 = vrot.slane %v2219_v9, 3  ;;  %v1947_v14 = vpop.f32.mrf.mxu2  ;;  %v2261_v22 = vrot.slane %v2259_v19, 2  ;;  %v2264_v24 = vrot.slane %v2262_v20, 3 }
 0x2c9   : > { %v1948_v17 = vadd.f32 %v1947_v14, %v1805_v7 }
 0x2ca   : > { %v2222_v18 = vor.u32 %v2221_v12, %v2218_v11  ;;  %v5199_v25 = vor.u32 %v2264_v24, %v2261_v22  ;;  %v2113_v24 = vpack.c.bf16 %v5193_v16, %v5193_v16 }
 0x2cb   : > { %v5196_v21 = vpack.c.bf16 %v1948_v17, %v5193_v16 }
 0x2cc   : > { %2289 = vrot.lane.b32.xlu1 %v2222_v18, %s4641_s2  ;;  %2223 = vrot.lane.b32.xlu0 %v2222_v18, %s4642_s29 }
 0x2cf   : > { %2016 = vrot.lane.b32.xlu2 %v1950_v31, %s4643_s24 }
 0x2d4   : > { %2287 = vrot.lane.b32.xlu1 %v2222_v18, %s4643_s24  ;;  %2291 = vrot.lane.b32.xlu0 %v5199_v25, %s4641_s2  ;;  %s5639_s24 = sld [smem:[#allocation26_spill]] (!%p4170_p5) }
 0x2d7   : > { %2077 = vrot.lane.b32.xlu2 %v1950_v31, %s4644_s8 }
 0x2dc   : > { %2416 = vrot.lane.b32.xlu1 %v2222_v18, %s4645_s9  ;;  %2347 = vrot.lane.b32.xlu0 %v2222_v18, %s4644_s8 }
 0x2df   : > { %2142 = vrot.lane.b32.xlu2 %v1988_v0, %s4646_s5 }
 0x2e4   : > { %2056 = vrot.lane.b32.xlu1 %v1988_v0, %s4647_s6  ;;  %1990 = vrot.lane.b32.xlu0 %v1988_v0, %s4648_s26 }
 0x2e7   : > { %2140 = vrot.lane.b32.xlu2 %v1950_v31, %s4645_s9 }
 0x2ef   : > { %2349 = vrot.lane.b32.xlu2 %v5199_v25, %s4640_s1  ;;  %s5638_s1 = sld [smem:[#allocation23_spill]] (!%p4170_p5) }
 0x2f7   : > { %2418 = vrot.lane.b32.xlu2 %v5199_v25, %s4646_s5 }
 0x2ff   : > { %2115 = vrot.lane.b32.xlu2 %v1988_v0, %s4649_s3 }
 0x319   : > { %v1953_v27 = vpop.permute.xlu2 %1952 }
 0x31a   : > { %v1959_v28 = vsel %vm1954_vm0, %v1953_v27, 0 }
 0x31b   : > { %1968 = vmatpush.bf16.xpose.msra.mxu3 %v1959_v28 }
 0x321   : > { %v2019_v29 = vpop.permute.xlu2 %2018 }
 0x322   : > { %3958 = vmatmul.msk.bf16.vlgmr.msra.gmra.mxu3 %vm1954_vm0, %v1950_v31 }
 0x329   : > { %v2017_v30 = vpop.permute.xlu2 %2016 }
 0x330   : > { %v2080_v32 = vpop.permute.xlu1 %2079  ;;  %v2021_v33 = vpop.permute.xlu0 %2020 }
 0x331   : > { %v2078_v34 = vpop.permute.xlu2 %2077  ;;  %v2085_v35 = vsel %vm1954_vm0, %v2080_v32, 0  ;;  %v2023_v36 = vsel %vm2022_vm1, %v2019_v29, %v2021_v33 }
 0x332   : > { %2094 = vmatpush.bf16.xpose.msrb.mxu2 %v2085_v35  ;;  %v2028_v37 = vsel %vm1954_vm0, %v2023_v36, 0 }
 0x333   : > { %2037 = vmatpush.bf16.xpose.msrb.mxu1 %v2028_v37 }
 0x339   : > { %v2143_v38 = vpop.permute.xlu2 %2142  ;;  %3962 = vmatmul.msk.bf16.vlgmr.msrb.gmra.mxu2 %vm1954_vm0, %v2078_v34 }
 0x33a   : > { %3960 = vmatmul.msk.bf16.vlgmr.msrb.gmra.mxu1 %vm1954_vm0, %v2017_v30  ;;  %v2148_v39 = vsel %vm1954_vm0, %v2143_v38, 0 }
 0x33b   : > { %2157 = vmatpush.bf16.xpose.msrb.mxu0 %v2148_v39 }
 0x33e   : > { %v2290_v40 = vpop.permute.xlu1 %2289  ;;  %v2224_v41 = vpop.permute.xlu0 %2223 }
 0x33f   : > { %v2229_v42 = vsel %vm1954_vm0, %v2224_v41, 0 }
 0x340   : > { %2238 = vmatpush.bf16.xpose.msra.mxu2 %v2229_v42 }
 0x341   : > { %v2141_v43 = vpop.permute.xlu2 %2140 }
 0x342   : > { %3964 = vmatmul.msk.bf16.vlgmr.msrb.gmra.mxu0 %vm1954_vm0, %v2141_v43 }
 0x346   : > { %v2288_v44 = vpop.permute.xlu1 %2287  ;;  %v2292_v45 = vpop.permute.xlu0 %2291 }
 0x347   : > { %v2293_v46 = vsel %vm2022_vm1, %v2290_v40, %v2292_v45 }
 0x348   : > { %v2298_v47 = vsel %vm1954_vm0, %v2293_v46, 0 }
 0x349   : > { %v2350_v48 = vpop.permute.xlu2 %2349  ;;  %3966 = vmatmul.msk.bf16.vlgmr.msra.gmra.mxu2 %vm1954_vm0, %v2222_v18  ;;  %2307 = vmatpush.bf16.xpose.msra.mxu0 %v2298_v47 }
 0x34a   : > { %v2355_v49 = vsel %vm1954_vm0, %v2350_v48, 0 }
 0x34b   : > { %2364 = vmatpush.bf16.xpose.msrb.mxu2 %v2355_v49 }
 0x34e   : > { %v2417_v50 = vpop.permute.xlu1 %2416  ;;  %v2348_v51 = vpop.permute.xlu0 %2347 }
 0x351   : > { %v2419_v52 = vpop.permute.xlu2 %2418 }
 0x352   : > { %v2424_v55 = vsel %vm1954_vm0, %v2419_v52, 0  ;;  %3968 = vmatmul.msk.bf16.vlgmr.msra.gmra.mxu0 %vm1954_vm0, %v2288_v44 }
 0x353   : > { %2433 = vmatpush.bf16.xpose.msrb.mxu0 %v2424_v55 }
 0x356   : > { %v2057_v57 = vpop.permute.xlu1 %2056  ;;  %v1991_v26 = vpop.permute.xlu0 %1990 }
 0x357   : > { %v2062_v58 = vand.u32 %v2057_v57, %v5225_v56  ;;  %v2001_v59 = vand.u32 %v5225_v56, %v1991_v26 }
 0x359   : > { %2010 = vmatpush.bf16.msrb.mxu3 %v2001_v59  ;;  %2071 = vmatpush.bf16.msra.mxu1 %v2062_v58  ;;  %v2116_v16 = vpop.permute.xlu2 %2115 }
 0x35a   : > { %3970 = vmatmul.msk.bf16.vlgmr.msrb.gmra.mxu2 %vm1954_vm0, %v2348_v51 }
 0x362   : > { %3972 = vmatmul.msk.bf16.vlgmr.msrb.gmra.mxu0 %vm1954_vm0, %v2417_v50 }
 0x3a5   : > { %v1970_v60 = vpop.f32.mrf.mxu3 }
 0x3a6   : > { %v1974_v8 = vmul.f32 0.20412415, %v1970_v60 }
 0x3a8   : > { %v1976_v10 = vsel %vm1975_vm4, %v1974_v8, -inf }
 0x3ad   : > { %v1972_v61 = vpop.f32.mrf.mxu3 }
 0x3b7   : > { %v2039_v62 = vpop.f32.mrf.mxu1 }
 0x3b8   : > { %v2043_v63 = vmul.f32 0.20412415, %v2039_v62 }
 0x3ba   : > { %v2044_v31 = vsel %vm1975_vm4, %v2043_v63, -inf }
 0x3bb   : > { %2045 = vmax.xlane.f32.xlu2 %v2044_v31  ;;  %v2385_v31 = vshrl.u32 %v5196_v21, 16 }
 0x3bc   : > { %v2096_v0 = vpop.f32.mrf.mxu2 }
 0x3bd   : > { %v2100_v1 = vmul.f32 0.20412415, %v2096_v0  ;;  %v2388_v0 = vshll.u32 %v5196_v21, 16 }
 0x3bf   : > { %v2159_v2 = vpop.f32.mrf.mxu0  ;;  %v2041_v3 = vpop.f32.mrf.mxu1  ;;  %v2101_v4 = vsel %vm1975_vm4, %v2100_v1, -inf }
 0x3c0   : > { %v2163_v5 = vmul.f32 0.20412415, %v2159_v2  ;;  %2102 = vmax.xlane.f32.xlu1 %v2101_v4  ;;  %v2387_v2 = vrot.slane %v2385_v31, 2  ;;  %v2390_v3 = vrot.slane %v2388_v0, 3 }
 0x3c2   : > { %v2164_v6 = vsel %vm1975_vm4, %v2163_v5, -inf  ;;  %v2391_v4 = vor.u32 %v2390_v3, %v2387_v2 }
 0x3c3   : > { %2165 = vmax.xlane.f32.xlu0 %v2164_v6 }
 0x3c4   : > { %v2098_v7 = vpop.f32.mrf.mxu2 }
 0x3c7   : > { %v2161_v9 = vpop.f32.mrf.mxu0 }
 0x3cb   : > { %1977 = vmax.xlane.f32.xlu0 %v1976_v10 }
 0x3cc   : > { %v2240_v11 = vpop.f32.mrf.mxu2 }
 0x3cd   : > { %v2244_v12 = vmul.f32 0.20412415, %v2240_v11 }
 0x3cf   : > { %v2309_v14 = vpop.f32.mrf.mxu0  ;;  %v2245_v17 = vsel %vm1975_vm4, %v2244_v12, -inf }
 0x3d0   : > { %v5236_v18 = vmul.f32 0.20412415, %v2309_v14  ;;  %2246 = vmax.xlane.f32.xlu2 %v2245_v17 }
 0x3d2   : > { %v2314_v19 = vsel %vm1975_vm4, %v5236_v18, -inf }
 0x3d3   : > { %2315 = vmax.xlane.f32.xlu1 %v2314_v19 }
 0x3d4   : > { %v2242_v20 = vpop.f32.mrf.mxu2 }
 0x3d7   : > { %v2311_v22 = vpop.f32.mrf.mxu0 }
 0x3dd   : > { %v2366_v27 = vpop.f32.mrf.mxu2 }
 0x3de   : > { %v2370_v32 = vmul.f32 0.20412415, %v2366_v27 }
 0x3df   : > { %2117 = vrot.lane.b32.xlu0 %v2113_v24, %s4649_s3  ;;  %v2435_v28 = vpop.f32.mrf.mxu0 }
 0x3e0   : > { %v2371_v33 = vsel %vm1975_vm4, %v2370_v32, -inf  ;;  %v5245_v34 = vmul.f32 0.20412415, %v2435_v28 }
 0x3e2   : > { %v2440_v35 = vsel %vm1975_vm4, %v5245_v34, -inf }
 0x3e5   : > { %v2368_v29 = vpop.f32.mrf.mxu2 }
 0x3e7   : > { %v2437_v30 = vpop.f32.mrf.mxu0 }
 0x3ec   : > { %2176 = vrot.lane.b32.xlu1 %v2113_v24, %s4651_s21 }
 0x409   : > { %2372 = vmax.xlane.f32.xlu0 %v2371_v33 }
 0x416   : > { %2441 = vmax.xlane.f32.xlu1 %v2440_v35 }
 0x42e   : > { %v2046_v36 = vpop.xlane.xlu2 %2045 }
 0x42f   : > { %v2047_v37 = vsub.f32 %v2043_v63, %v2046_v36 }
 0x431   : > { %v2048_v38 = vmul.f32 1.442695, %v2047_v37 }
 0x433   : > { %4511 = vpow2.f32 %v2048_v38  ;;  %v2103_v44 = vpop.xlane.xlu1 %2102 }
 0x434   : > { %v2104_v48 = vsub.f32 %v2100_v1, %v2103_v44 }
 0x436   : > { %v2166_v39 = vpop.xlane.xlu0 %2165  ;;  %v2105_v53 = vmul.f32 1.442695, %v2104_v48 }
 0x437   : > { %v2167_v40 = vsub.f32 %v2163_v5, %v2166_v39 }
 0x439   : > { %v5249_v41 = vpop.eup %4511  ;;  %v2168_v42 = vmul.f32 1.442695, %v2167_v40 }
 0x43a   : > { %v2050_v43 = vsel %vm1975_vm4, %v5249_v41, 0.0 }
 0x43b   : > { %4513 = vpow2.f32 %v2168_v42  ;;  %2051 = vadd.xlane.f32.xlu2 %v2050_v43 }
 0x43e   : > { %v1978_v45 = vpop.xlane.xlu0 %1977 }
 0x43f   : > { %v1979_v46 = vsub.f32 %v1974_v8, %v1978_v45 }
 0x441   : > { %v5253_v47 = vpop.eup %4513  ;;  %v1980_v49 = vmul.f32 1.442695, %v1979_v46 }
 0x442   : > { %v2170_v50 = vsel %vm1975_vm4, %v5253_v47, 0.0 }
 0x443   : > { %4515 = vpow2.f32 %v1980_v49  ;;  %2171 = vadd.xlane.f32.xlu0 %v2170_v50  ;;  %v2247_v51 = vpop.xlane.xlu2 %2246 }
 0x444   : > { %v2248_v52 = vsub.f32 %v2244_v12, %v2247_v51 }
 0x446   : > { %v2249_v54 = vmul.f32 1.442695, %v2248_v52  ;;  %v2316_v1 = vpop.xlane.xlu1 %2315 }
 0x447   : > { %v2317_v9 = vsub.f32 %v5236_v18, %v2316_v1 }
 0x448   : > { %4517 = vpow2.f32 %v2249_v54 }
 0x449   : > { %v5257_v55 = vpop.eup %4515  ;;  %4519 = vpow2.f32 %v2105_v53  ;;  %v2318_v10 = vmul.f32 1.442695, %v2317_v9 }
 0x44a   : > { %v1982_v57 = vsel %vm1975_vm4, %v5257_v55, 0.0 }
 0x44b   : > { %1983 = vadd.xlane.f32.xlu2 %v1982_v57 }
 0x44e   : > { %v5261_v26 = vpop.eup %4517 }
 0x44f   : > { %v5263_v58 = vpop.eup %4519  ;;  %v2251_v59 = vsel %vm1975_vm4, %v5261_v26, 0.0 }
 0x450   : > { %2252 = vadd.xlane.f32.xlu1 %v2251_v59  ;;  %v2107_v62 = vsel %vm1975_vm4, %v5263_v58, 0.0 }
 0x451   : > { %v2118_v60 = vpop.permute.xlu0 %2117 }
 0x452   : > { %v2120_v61 = vsel %vm2119_vm5, %v2116_v16, %v2118_v60 }
 0x453   : > { %v2125_v63 = vand.u32 %v2120_v61, %v5225_v56  ;;  %2108 = vadd.xlane.f32.xlu2 %v2107_v62 }
 0x455   : > { %2134 = vmatpush.bf16.msra.mxu3 %v2125_v63 }
 0x457   : > { %2326 = vrot.lane.b32.xlu0 %v5199_v25, %s4647_s6  ;;  %s5642_s6 = sld [smem:[#allocation24_spill]] (!%p4170_p5) }
 0x45e   : > { %v2177_v5 = vpop.permute.xlu1 %2176 }
 0x45f   : > { %v2182_v6 = vand.u32 %v2177_v5, %v5225_v56  ;;  %2394 = vrot.lane.b32.xlu0 %v2391_v4, %s4649_s3 }
 0x461   : > { %2191 = vmatpush.bf16.msrb.mxu1 %v2182_v6 }
 0x467   : > { %2452 = vrot.lane.b32.xlu0 %v2391_v4, %s4651_s21  ;;  %s5643_s21 = sld [smem:[#allocation25_spill]] (!%p4170_p5) }
 0x46b   : > { %2266 = vrot.lane.b32.xlu2 %v5199_v25, %s4648_s26 }
 0x47c   : > { %v2373_v21 = vpop.xlane.xlu0 %2372 }
 0x47d   : > { %v2374_v7 = vsub.f32 %v2370_v32, %v2373_v21 }
 0x47f   : > { %v2375_v8 = vmul.f32 1.442695, %v2374_v7 }
 0x481   : > { %4521 = vpow2.f32 %v2375_v8 }
 0x482   : > { %4523 = vpow2.f32 %v2318_v10 }
 0x487   : > { %v5281_v11 = vpop.eup %4521 }
 0x488   : > { %v2377_v12 = vsel %vm1975_vm4, %v5281_v11, 0.0  ;;  %v4524_v20 = vpop.eup %4523 }
 0x489   : > { %v2442_v14 = vpop.xlane.xlu1 %2441  ;;  %2378 = vadd.xlane.f32.xlu1 %v2377_v12  ;;  %v2320_v22 = vsel %vm1975_vm4, %v4524_v20, 0.0 }
 0x48a   : > { %v2443_v17 = vsub.f32 %v5245_v34, %v2442_v14 }
 0x48c   : > { %v2444_v19 = vmul.f32 1.442695, %v2443_v17 }
 0x48e   : > { %4525 = vpow2.f32 %v2444_v19 }
 0x494   : > { %2321 = vadd.xlane.f32.xlu2 %v2320_v22  ;;  %v5287_v24 = vpop.eup %4525 }
 0x495   : > { %v2446_v18 = vsel %vm1975_vm4, %v5287_v24, 0.0 }
 0x49c   : > { %2447 = vadd.xlane.f32.xlu2 %v2446_v18 }
 0x4a2   : > { %2392 = vrot.lane.b32.xlu1 %v5199_v25, %s4649_s3 }
 0x4ae   : > { %v2052_v27 = vpop.xlane.xlu2 %2051 }
 0x4af   : > { %4527 = vrcp.f32 %v2052_v27  ;;  %v4373_v27 = vld [vmem:[%s4836_s0 + $0x28] sm:$0xff] }
 0x4b0   : > { %2547 = vmatpush.bf16.msra.mxu2 %v4373_v27  ;;  %v4383_v27 = vld [vmem:[%s4841_s10 + $0x4c] sm:$0xf] }
 0x4b5   : > { %v4528_v28 = vpop.eup %4527 }
 0x4b6   : > { %v2054_v29 = vmul.f32 %v4528_v28, %v5249_v41  ;;  %v2172_v32 = vpop.xlane.xlu0 %2171  ;;  %v4372_v28 = vld [vmem:[%s4836_s0 + $0x20] sm:$0xff] }
 0x4b7   : > { %4529 = vrcp.f32 %v2172_v32  ;;  %2548 = vmatpush.bf16.msra.mxu2 %v4372_v28  ;;  %v4369_v32 = vld [vmem:[%s4836_s0 + $0x8] sm:$0xff] }
 0x4b8   : > { %v2055_v30 = vpack.c.bf16 %v2054_v29, %v2054_v29  ;;  %v4371_v29 = vld [vmem:[%s4836_s0 + $0x18] sm:$0xff] }
 0x4ba   : > { %3961 = vmatmul.msk.bf16.vlgmr.msra.gmra.mxu1 %vm1992_vm6, %v2055_v30  ;;  %v4370_v30 = vld [vmem:[%s4836_s0 + $0x10] sm:$0xff] }
 0x4bb   : > { %2549 = vmatpush.bf16.msra.mxu2 %v4371_v29  ;;  %v4039_v29 = vld [vmem:[%s4841_s10 + $0x54] sm:$0xf0] }
 0x4bd   : > { %v4530_v34 = vpop.eup %4529 }
 0x4be   : > { %v1984_v33 = vpop.xlane.xlu2 %1983  ;;  %v2174_v35 = vmul.f32 %v4530_v34, %v5253_v47 }
 0x4bf   : > { %4531 = vrcp.f32 %v1984_v33  ;;  %2550 = vmatpush.bf16.msra.mxu2 %v4370_v30  ;;  %v4368_v33 = vld [vmem:[%s4836_s0] sm:$0xff]  ;;  %v4045_v30 = vld [vmem:[%s4841_s10 + $0x50] sm:$0xf] }
 0x4c0   : > { %v2175_v37 = vpack.c.bf16 %v2174_v35, %v2174_v35 }
 0x4c3   : > { %v2253_v46 = vpop.xlane.xlu1 %2252  ;;  %2551 = vmatpush.bf16.msra.mxu2 %v4369_v32  ;;  %v4385_v32 = vld [vmem:[%s4841_s10 + $0x58] sm:$0xf0] }
 0x4c5   : > { %v4532_v16 = vpop.eup %4531 }
 0x4c6   : > { %v1986_v36 = vmul.f32 %v4532_v16, %v5257_v55  ;;  %v2109_v25 = vpop.xlane.xlu2 %2108 }
 0x4c7   : > { %4533 = vrcp.f32 %v2109_v25  ;;  %2552 = vmatpush.bf16.msra.mxu2 %v4368_v33  ;;  %v4042_v33 = vor.u32 %v4383_v27, %v4039_v29 }
 0x4c8   : > { %v1987_v38 = vpack.c.bf16 %v1986_v36, %v1986_v36  ;;  %4535 = vrcp.f32 %v2253_v46 }
 0x4c9   : > { %v2327_v39 = vpop.permute.xlu0 %2326 }
 0x4ca   : > { %v2332_v40 = vand.u32 %v2327_v39, %v5225_v56  ;;  %3959 = vmatmul.msk.bf16.vlgmr.msrb.gmra.mxu3 %vm1992_vm6, %v1987_v38  ;;  %3965 = vmatmul.msk.bf16.vlgmr.msrb.gmra.mxu1 %vm1992_vm6, %v2175_v37 }
 0x4cc   : > { %2341 = vmatpush.bf16.msra.mxu1 %v2332_v40 }
 0x4cd   : > { %v4534_v43 = vpop.eup %4533 }
 0x4ce   : > { %v2267_v41 = vpop.permute.xlu2 %2266  ;;  %v2111_v45 = vmul.f32 %v4534_v43, %v5263_v58  ;;  %v4536_v50 = vpop.eup %4535 }
 0x4cf   : > { %v2272_v42 = vand.u32 %v2267_v41, %v5225_v56  ;;  %v2255_v51 = vmul.f32 %v4536_v50, %v5261_v26  ;;  %v4501_v50 = vld [vmem:[%s897_s18] ss:$0 sm:$0xff] }
 0x4d0   : > { %v2112_v47 = vpack.c.bf16 %v2111_v45, %v2111_v45 }
 0x4d1   : > { %v2395_v44 = vpop.permute.xlu0 %2394  ;;  %2281 = vmatpush.bf16.msrb.mxu3 %v2272_v42  ;;  %v2256_v52 = vpack.c.bf16 %v2255_v51, %v2255_v51 }
 0x4d9   : > { %v2453_v48 = vpop.permute.xlu0 %2452 }
 0x4da   : > { %v2458_v49 = vand.u32 %v2453_v48, %v5225_v56  ;;  %3963 = vmatmul.msk.bf16.vlgmr.msra.gmra.mxu3 %vm1992_vm6, %v2112_v47 }
 0x4dc   : > { %2467 = vmatpush.bf16.msrb.mxu1 %v2458_v49 }
 0x4ea   : > { %3967 = vmatmul.msk.bf16.vlgmr.msrb.gmra.mxu3 %vm1992_vm6, %v2256_v52 }
 0x4fc   : > { %v2379_v54 = vpop.xlane.xlu1 %2378 }
 0x507   : > { %v2322_v53 = vpop.xlane.xlu2 %2321 }
 0x508   : > { %4537 = vrcp.f32 %v2322_v53 }
 0x509   : > { %4539 = vrcp.f32 %v2379_v54 }
 0x50e   : > { %v4538_v55 = vpop.eup %4537 }
 0x50f   : > { %v2324_v57 = vmul.f32 %v4538_v55, %v4524_v20  ;;  %v2448_v59 = vpop.xlane.xlu2 %2447  ;;  %v4540_v60 = vpop.eup %4539 }
 0x510   : > { %4541 = vrcp.f32 %v2448_v59  ;;  %v2381_v62 = vmul.f32 %v4540_v60, %v5281_v11 }
 0x511   : > { %v2325_v58 = vpack.c.bf16 %v2324_v57, %v2324_v57 }
 0x512   : > { %v2382_v31 = vpack.c.bf16 %v2381_v62, %v2381_v62 }
 0x513   : > { %3969 = vmatmul.msk.bf16.vlgmr.msra.gmra.mxu1 %vm1992_vm6, %v2325_v58 }
 0x514   : > { %v2393_v61 = vpop.permute.xlu1 %2392 }
 0x515   : > { %v2396_v26 = vsel %vm2119_vm5, %v2393_v61, %v2395_v44 }
 0x516   : > { %v2401_v63 = vand.u32 %v2396_v26, %v5225_v56  ;;  %v4542_v0 = vpop.eup %4541 }
 0x517   : > { %v2450_v1 = vmul.f32 %v4542_v0, %v5287_v24 }
 0x518   : > { %2410 = vmatpush.bf16.msra.mxu3 %v2401_v63 }
 0x519   : > { %v2451_v2 = vpack.c.bf16 %v2450_v1, %v2450_v1 }
 0x51b   : > { %3971 = vmatmul.msk.bf16.vlgmr.msra.gmra.mxu3 %vm1992_vm6, %v2382_v31 }
 0x523   : > { %3973 = vmatmul.msk.bf16.vlgmr.msrb.gmra.mxu1 %vm1992_vm6, %v2451_v2  ;;  %v4061_v2 = vld [vmem:[%s4841_s10 + $0x78] sm:$0xf] }
 0x537   : > { %v2073_v3 = vpop.f32.mrf.mxu1 }
 0x53f   : > { %v2075_v4 = vpop.f32.mrf.mxu1 }
 0x540   : > { %v4389_v4 = vld [vmem:[%s4841_s10 + $0x7c] sm:$0xf] }
 0x547   : > { %v2193_v5 = vpop.f32.mrf.mxu1 }
 0x54d   : > { %v2012_v6 = vpop.f32.mrf.mxu3 }
 0x54f   : > { %v2195_v21 = vpop.f32.mrf.mxu1 }
 0x550   : > { %v4069_v21 = vld [vmem:[%s4841_s10 + $0x80] sm:$0xf] }
 0x555   : > { %v2014_v7 = vpop.f32.mrf.mxu3 }
 0x556   : > { %v4391_v7 = vld [vmem:[%s4841_s10 + $0x88] sm:$0xf0] }
 0x55d   : > { %v2136_v8 = vpop.f32.mrf.mxu3 }
 0x565   : > { %v2138_v9 = vpop.f32.mrf.mxu3 }
 0x566   : > { %v4070_v9 = vor.u32 %v4391_v7, %v4069_v21 }
 0x568   : > { %2783 = vmatpush.bf16.msra.mxu1 %v4070_v9 }
 0x56d   : > { %v2283_v10 = vpop.f32.mrf.mxu3 }
 0x575   : > { %v2285_v56 = vpop.f32.mrf.mxu3 }
 0x576   : > { %v4387_v56 = vld [vmem:[%s4841_s10 + $0x68] sm:$0xf0] }
 0x590   : > { %v2343_v11 = vpop.f32.mrf.mxu1 }
 0x591   : > { %v4484_v12 = vpack.i.bf16 %v2073_v3, %v2343_v11  ;;  %v4390_v3 = vld [vmem:[%s4841_s10 + $0x80] sm:$0xf0] }
 0x592   : > { %v4386_v11 = vld [vmem:[%s4841_s10 + $0x64] sm:$0xf] }
 0x593   : > { %4485 = vrot.lane.b32.xlu2 %v4484_v12, %s4652_s23 }
 0x598   : > { %v2345_v14 = vpop.f32.mrf.mxu1 }
 0x599   : > { %v4051_v14 = vld [vmem:[%s4841_s10 + $0x6c] sm:$0xf0] }
 0x59e   : > { %v2412_v17 = vpop.f32.mrf.mxu3 }
 0x59f   : > { %v4489_v19 = vpack.i.bf16 %v2136_v8, %v2412_v17  ;;  %v4057_v17 = vld [vmem:[%s4841_s10 + $0x68] sm:$0xf] }
 0x5a0   : > { %v2469_v20 = vpop.f32.mrf.mxu1 }
 0x5a1   : > { %v4494_v22 = vpack.i.bf16 %v2193_v5, %v2469_v20  ;;  %4490 = vrot.lane.b32.xlu0 %v4489_v19, %s4653_s25  ;;  %v4062_v5 = vor.u32 %v4390_v3, %v4061_v2  ;;  %v4388_v19 = vld [vmem:[%s4841_s10 + $0x70] sm:$0xf0]  ;;  %v4054_v20 = vor.u32 %v4386_v11, %v4051_v14 }
 0x5a3   : > { %4495 = vrot.lane.b32.xlu1 %v4494_v22, %s4654_s4  ;;  %2755 = vmatpush.bf16.msrb.mxu3 %v4062_v5  ;;  %v4058_v22 = vor.u32 %v4388_v19, %v4057_v17 }
 0x5a5   : > { %2784 = vmatpush.bf16.msra.mxu1 %v4058_v22 }
 0x5a6   : > { %v2414_v24 = vpop.f32.mrf.mxu3 }
 0x5a7   : > { %v4037_v24 = vld [vmem:[%s4841_s10 + $0x48] sm:$0xf] }
 0x5a8   : > { %v2471_v18 = vpop.f32.mrf.mxu1 }
 0x5a9   : > { %v4384_v18 = vld [vmem:[%s4841_s10 + $0x50] sm:$0xf0] }
 0x5aa   : > { %v4038_v28 = vor.u32 %v4384_v18, %v4037_v24 }
 0x5ed   : > { %v4486_v34 = vpop.permute.xlu2 %4485 }
 0x5ee   : > { %v4487_v35 = vunpack.i.l.bf16 %v4486_v34  ;;  %v4488_v16 = vunpack.i.h.bf16 %v4486_v34  ;;  %v4046_v34 = vor.u32 %v4385_v32, %v4045_v30  ;;  %v4415_v30 = vld [vmem:[%s4856_s22 + $0xb8] sm:$0xff]  ;;  %v4414_v32 = vld [vmem:[%s4856_s22 + $0xb0] sm:$0xff] }
 0x5f0   : > { %v2485_v38 = vsel %vm1954_vm0, %v2283_v10, %v4487_v35  ;;  %v2209_v40 = vsel %vm1954_vm0, %v2012_v6, %v4488_v16  ;;  %v4063_v6 = vld [vmem:[%s4841_s10 + $0x84] sm:$0xf0]  ;;  %v4049_v10 = vld [vmem:[%s4841_s10 + $0x60] sm:$0xf]  ;;  %2785 = vmatpush.bf16.msra.mxu1 %v4046_v34  ;;  %v4025_v35 = vld [vmem:[%s4841_s10 + $0x30] sm:$0xf] }
 0x5f1   : > { %v4066_v8 = vor.u32 %v4389_v4, %v4063_v6  ;;  %v4050_v12 = vor.u32 %v4387_v56, %v4049_v10  ;;  %v4381_v16 = vld [vmem:[%s4841_s10 + $0x38] sm:$0xf0]  ;;  %v4405_v34 = vld [vmem:[%s4856_s22 + $0x68] sm:$0xff] }
 0x5f3   : > { %2769 = vmatpush.bf16.msra.mxu0 %v4066_v8  ;;  %2756 = vmatpush.bf16.msrb.mxu3 %v4050_v12 }
 0x5f7   : > { %2770 = vmatpush.bf16.msra.mxu0 %v4054_v20  ;;  %2757 = vmatpush.bf16.msrb.mxu3 %v4038_v28  ;;  %v4503_v20 = vld [vmem:[%s4815_s30 + $0x3] ss:$0 sm:$0xff] }
 0x5fb   : > { %2771 = vmatpush.bf16.msra.mxu0 %v4042_v33  ;;  %v4399_v33 = vld [vmem:[%s4856_s22 + $0x38] sm:$0xff] }
 0x5fc   : > { %3044 = vmatpush.bf16.msrb.mxu2 %v4399_v33 }
 0x613   : > { %v4491_v36 = vpop.permute.xlu0 %4490 }
 0x614   : > { %v4493_v25 = vunpack.i.h.bf16 %v4491_v36  ;;  %v4492_v37 = vunpack.i.l.bf16 %v4491_v36  ;;  %v4380_v36 = vld [vmem:[%s4841_s10 + $0x34] sm:$0xf] }
 0x615   : > { %v4496_v39 = vpop.permute.xlu1 %4495 }
 0x616   : > { %v2486_v41 = vsel %vm2210_vm9, %v2485_v38, %v4492_v37  ;;  %v4498_v42 = vunpack.i.h.bf16 %v4496_v39  ;;  %v4497_v43 = vunpack.i.l.bf16 %v4496_v39  ;;  %v2211_v44 = vsel %vm2210_vm9, %v2209_v40, %v4493_v25  ;;  %v4027_v37 = vld [vmem:[%s4841_s10 + $0x3c] sm:$0xf0]  ;;  %v4033_v38 = vld [vmem:[%s4841_s10 + $0x38] sm:$0xf]  ;;  %v4382_v39 = vld [vmem:[%s4841_s10 + $0x40] sm:$0xf0] }
 0x617   : > { %v4026_v25 = vor.u32 %v4381_v16, %v4025_v35  ;;  %v4030_v40 = vor.u32 %v4380_v36, %v4027_v37  ;;  %v4413_v35 = vld [vmem:[%s4856_s22 + $0xa8] sm:$0xff]  ;;  %v4398_v16 = vld [vmem:[%s4856_s22 + $0x30] sm:$0xff]  ;;  %v4404_v36 = vld [vmem:[%s4856_s22 + $0x60] sm:$0xff] }
 0x618   : > { %v2487_v45 = vsel %vm2212_vm10, %v2486_v41, %v4497_v43  ;;  %v2213_v47 = vsel %vm2212_vm10, %v2211_v44, %v4498_v42  ;;  %v4034_v41 = vor.u32 %v4382_v39, %v4033_v38  ;;  %v4013_v42 = vld [vmem:[%s4841_s10 + $0x18] sm:$0xf]  ;;  %v4378_v43 = vld [vmem:[%s4841_s10 + $0x20] sm:$0xf0]  ;;  %v4377_v44 = vld [vmem:[%s4841_s10 + $0x1c] sm:$0xf]  ;;  %3045 = vmatpush.bf16.msrb.mxu2 %v4398_v16 }
 0x619   : > { %v2489_v46 = vrot.slane %v2487_v45, 3  ;;  %2758 = vmatpush.bf16.msrb.mxu3 %v4026_v25  ;;  %2772 = vmatpush.bf16.msra.mxu0 %v4030_v40  ;;  %v4014_v45 = vor.u32 %v4378_v43, %v4013_v42  ;;  %v4412_v25 = vld [vmem:[%s4856_s22 + $0xa0] sm:$0xff]  ;;  %v4397_v37 = vld [vmem:[%s4856_s22 + $0x28] sm:$0xff]  ;;  %v4403_v38 = vld [vmem:[%s4856_s22 + $0x58] sm:$0xff] }
 0x61a   : > { %2786 = vmatpush.bf16.msra.mxu1 %v4034_v41  ;;  %v4411_v39 = vld [vmem:[%s4856_s22 + $0x98] sm:$0xff]  ;;  %v4396_v40 = vld [vmem:[%s4856_s22 + $0x20] sm:$0xff]  ;;  %v4402_v41 = vld [vmem:[%s4856_s22 + $0x50] sm:$0xff] }
 0x61b   : > { %v2492_v48 = vsel %vm2491_vm11, %v2213_v47, %v2489_v46  ;;  %v4021_v47 = vld [vmem:[%s4841_s10 + $0x20] sm:$0xf]  ;;  %v4410_v42 = vld [vmem:[%s4856_s22 + $0x90] sm:$0xff] }
 0x61c   : > { %v2505_v49 = vpack.c.bf16 %v2489_v46, %v2492_v48  ;;  %v4015_v46 = vld [vmem:[%s4841_s10 + $0x24] sm:$0xf0]  ;;  %v4379_v48 = vld [vmem:[%s4841_s10 + $0x28] sm:$0xf0]  ;;  %3046 = vmatpush.bf16.msrb.mxu2 %v4397_v37  ;;  %v2646_v43 = vld [vmem:[%s4846_s7] sm:$0x7] }
 0x61d   : > { %2759 = vmatpush.bf16.msrb.mxu3 %v4014_v45  ;;  %v4401_v45 = vld [vmem:[%s4856_s22 + $0x48] sm:$0xff]  ;;  %s5637_s7 = sld [smem:[#allocation22_spill]] (!%p4170_p5) }
 0x61e   : > { %3998 = vmatmul.msk.bf16.vlgmr.msra.gmra.mxu2 %vm1713_vm7, %v2505_v49  ;;  %v4018_v49 = vor.u32 %v4377_v44, %v4015_v46  ;;  %v4395_v44 = vld [vmem:[%s4856_s22 + $0x18] sm:$0xff]  ;;  %v4409_v46 = vld [vmem:[%s4856_s22 + $0x88] sm:$0xff] }
 0x620   : > { %2773 = vmatpush.bf16.msra.mxu0 %v4018_v49  ;;  %3047 = vmatpush.bf16.msrb.mxu2 %v4396_v40  ;;  %v4394_v49 = vld [vmem:[%s4856_s22 + $0x10] sm:$0xff] }
 0x624   : > { %3048 = vmatpush.bf16.msrb.mxu2 %v4395_v44 }
 0x628   : > { %3049 = vmatpush.bf16.msrb.mxu2 %v4394_v49 }
 0x6a1   : > { %v2554_v51 = vpop.f32.mrf.mxu2 }
 0x6a2   : > { %v2559_v52 = vadd.f32 %v2554_v51, %v5120_v13 }
 0x6a4   : > { %v5328_v53 = vadd.f32 %v4501_v50, %v2559_v52 }
 0x6a6   : > { %v2567_v54 = vsel %vm1713_vm7, %v5328_v53, 0.0 }
 0x6a7   : > { %2568 = vadd.xlane.f32.xlu0 %v2567_v54  ;;  %v4001_v54 = vld [vmem:[%s4841_s10] sm:$0xf] }
 0x6a9   : > { %v2556_v55 = vpop.f32.mrf.mxu2 }
 0x6aa   : > { %v2560_v57 = vadd.f32 %v2556_v55, %v5124_v15  ;;  %v4375_v55 = vld [vmem:[%s4841_s10 + $0x8] sm:$0xf0] }
 0x6ac   : > { %v5333_v58 = vadd.f32 %v4501_v50, %v2560_v57  ;;  %v4022_v50 = vor.u32 %v4379_v48, %v4021_v47  ;;  %v4374_v57 = vld [vmem:[%s4841_s10 + $0x4] sm:$0xf]  ;;  %v2649_v47 = vperm.slane %v2646_v43, 1  ;;  %v2650_v48 = vperm.slane %v2646_v43, 2 }
 0x6ae   : > { %v2570_v59 = vsel %vm1717_vm8, %v5333_v58, 0.0  ;;  %2787 = vmatpush.bf16.msra.mxu1 %v4022_v50 }
 0x6af   : > { %2571 = vadd.xlane.f32.xlu1 %v2570_v59  ;;  %v4002_v59 = vor.u32 %v4375_v55, %v4001_v54 }
 0x6b1   : > { %2760 = vmatpush.bf16.msrb.mxu3 %v4002_v59  ;;  %v4393_v59 = vld [vmem:[%s4856_s22 + $0x8] sm:$0xff] }
 0x6b2   : > { %3050 = vmatpush.bf16.msrb.mxu2 %v4393_v59 }
 0x71a   : > { %v2569_v60 = vpop.xlane.xlu0 %2568 }
 0x71b   : > { %v2573_v13 = vmul.f32 %v2569_v60, %v5128_v23  ;;  %v4003_v60 = vld [vmem:[%s4841_s10 + $0xc] sm:$0xf0] }
 0x71d   : > { %v5339_v61 = vsub.f32 %v5328_v53, %v2573_v13  ;;  %v4009_v13 = vld [vmem:[%s4841_s10 + $0x8] sm:$0xf] }
 0x71f   : > { %v2577_v15 = vmul.f32 %v5339_v61, %v5339_v61 }
 0x721   : > { %v2579_v62 = vsel %vm1713_vm7, %v2577_v15, 0.0  ;;  %v4376_v15 = vld [vmem:[%s4841_s10 + $0x10] sm:$0xf0] }
 0x722   : > { %2580 = vadd.xlane.f32.xlu2 %v2579_v62  ;;  %v2572_v26 = vpop.xlane.xlu1 %2571 }
 0x723   : > { %v2574_v63 = vmul.f32 %v2572_v26, %v5128_v23  ;;  %v4006_v26 = vor.u32 %v4374_v57, %v4003_v60 }
 0x725   : > { %v5346_v31 = vsub.f32 %v5333_v58, %v2574_v63  ;;  %v4010_v63 = vor.u32 %v4376_v15, %v4009_v13  ;;  %2774 = vmatpush.bf16.msra.mxu0 %v4006_v26  ;;  %v2648_v13 = vperm.slane %v2646_v43, 0 }
 0x727   : > { %v2578_v0 = vmul.f32 %v5346_v31, %v5346_v31  ;;  %2788 = vmatpush.bf16.msra.mxu1 %v4010_v63 }
 0x729   : > { %v2582_v1 = vsel %vm1717_vm8, %v2578_v0, 0.0  ;;  %3072 = vmatpush.bf16.msrb.mxu0 %v4415_v30 }
 0x72a   : > { %2583 = vadd.xlane.f32.xlu0 %v2582_v1 }
 0x72d   : > { %3073 = vmatpush.bf16.msrb.mxu0 %v4414_v32 }
 0x731   : > { %3074 = vmatpush.bf16.msrb.mxu0 %v4413_v35 }
 0x735   : > { %3075 = vmatpush.bf16.msrb.mxu0 %v4412_v25 }
 0x739   : > { %3076 = vmatpush.bf16.msrb.mxu0 %v4411_v39 }
 0x73d   : > { %3077 = vmatpush.bf16.msrb.mxu0 %v4410_v42 }
 0x741   : > { %3078 = vmatpush.bf16.msrb.mxu0 %v4409_v46 }
 0x795   : > { %v2581_v51 = vpop.xlane.xlu2 %2580 }
 0x796   : > { %v2585_v52 = vmul.f32 %v2581_v51, %v5128_v23  ;;  %v4400_v51 = vld [vmem:[%s4856_s22 + $0x40] sm:$0xff] }
 0x798   : > { %v2587_v62 = vadd.f32 1e-12, %v2585_v52  ;;  %v4408_v52 = vld [vmem:[%s4856_s22 + $0x80] sm:$0xff] }
 0x799   : > { %3079 = vmatpush.bf16.msrb.mxu0 %v4408_v52 }
 0x79a   : > { %4543 = vrsqrt.f32 %v2587_v62  ;;  %vm2595_vm13 = vweird.f32 %v2587_v62 }
 0x79d   : > { %v2584_v0 = vpop.xlane.xlu0 %2583 }
 0x79e   : > { %v2586_v1 = vmul.f32 %v2584_v0, %v5128_v23  ;;  %v4502_v23 = vld [vmem:[%s4815_s30 + $0x2] ss:$0 sm:$0xff]  ;;  %s5645_s30 = sld [smem:[#allocation29_spill]] (!%p4170_p5) }
 0x79f   : > { %v4392_v0 = vld [vmem:[%s4856_s22] sm:$0xff] }
 0x7a0   : > { %v4544_v2 = vpop.eup %4543  ;;  %v2588_v3 = vadd.f32 1e-12, %v2586_v1  ;;  %3051 = vmatpush.bf16.msrb.mxu2 %v4392_v0 }
 0x7a1   : > { %v2590_v4 = vmul.f32 %v4544_v2, %v2587_v62  ;;  %vm2596_vm12 = vweird.f32 %v4544_v2 }
 0x7a2   : > { %4545 = vrsqrt.f32 %v2588_v3  ;;  %vm2597_vm14 = vmor %vm2595_vm13, %vm2596_vm12  ;;  %vm2605_vm0 = vweird.f32 %v2588_v3 }
 0x7a3   : > { %v2591_v5 = vmul.f32 %v4544_v2, %v2590_v4 }
 0x7a5   : > { %v2592_v6 = vmul.f32 0.5, %v2591_v5 }
 0x7a7   : > { %v2593_v21 = vsub.f32 1.5, %v2592_v6 }
 0x7a8   : > { %v4546_v7 = vpop.eup %4545 }
 0x7a9   : > { %v2594_v8 = vmul.f32 %v4544_v2, %v2593_v21  ;;  %v2600_v9 = vmul.f32 %v4546_v7, %v2588_v3  ;;  %vm2606_vm15 = vweird.f32 %v4546_v7 }
 0x7aa   : > { %vm2607_vm1 = vmor %vm2605_vm0, %vm2606_vm15 }
 0x7ab   : > { %v2601_v10 = vmul.f32 %v4546_v7, %v2600_v9  ;;  %v2598_v56 = vsel %vm2597_vm14, %v4544_v2, %v2594_v8 }
 0x7ac   : > { %v2609_v14 = vmul.f32 %v2598_v56, %v5339_v61  ;;  %v4407_v61 = vld [vmem:[%s4856_s22 + $0x78] sm:$0xff] }
 0x7ad   : > { %v2602_v11 = vmul.f32 0.5, %v2601_v10  ;;  %3058 = vmatpush.bf16.msra.mxu3 %v4407_v61 }
 0x7ae   : > { %v2614_v22 = vmul.f32 %v4502_v23, %v2609_v14 }
 0x7af   : > { %v2603_v12 = vsub.f32 1.5, %v2602_v11 }
 0x7b0   : > { %v2619_v27 = vadd.f32 %v4503_v20, %v2614_v22 }
 0x7b1   : > { %v2604_v17 = vmul.f32 %v4546_v7, %v2603_v12 }
 0x7b3   : > { %v2608_v19 = vsel %vm2607_vm1, %v4546_v7, %v2604_v17 }
 0x7b4   : > { %v2610_v24 = vmul.f32 %v2608_v19, %v5346_v31  ;;  %v4406_v31 = vld [vmem:[%s4856_s22 + $0x70] sm:$0xff]  ;;  %s5641_s22 = sld [smem:[#allocation28_spill]] (!%p4170_p5) }
 0x7b5   : > { %3059 = vmatpush.bf16.msra.mxu3 %v4406_v31 }
 0x7b6   : > { %v2615_v18 = vmul.f32 %v4502_v23, %v2610_v24 }
 0x7b8   : > { %v2620_v28 = vadd.f32 %v4503_v20, %v2615_v18 }
 0x7b9   : > { %3060 = vmatpush.bf16.msra.mxu3 %v4405_v34 }
 0x7ba   : > { %v2645_v29 = vpack.c.bf16 %v2620_v28, %v2619_v27 }
 0x7bc   : > { %4071 = vmatmul.msk.bf16.vlgmr.msrb.gmra.mxu3 %vm1713_vm7, %v2645_v29  ;;  %4072 = vmatmul.msk.bf16.vlgmr.msra.gmra.mxu0 %vm1713_vm7, %v2645_v29 }
 0x7bd   : > { %4073 = vmatmul.msk.bf16.vlgmr.msra.gmra.mxu1 %vm1713_vm7, %v2645_v29  ;;  %3061 = vmatpush.bf16.msra.mxu3 %v4404_v36 }
 0x7c1   : > { %3062 = vmatpush.bf16.msra.mxu3 %v4403_v38 }
 0x7c5   : > { %3063 = vmatpush.bf16.msra.mxu3 %v4402_v41 }
 0x7c9   : > { %3064 = vmatpush.bf16.msra.mxu3 %v4401_v45 }
 0x7cd   : > { %3065 = vmatpush.bf16.msra.mxu3 %v4400_v51 }
 0x839   : > { %v2776_v50 = vpop.f32.mrf.mxu0 }
 0x83a   : > { %v5419_v54 = vadd.f32 %v2776_v50, %v2649_v47  ;;  %v2790_v55 = vpop.f32.mrf.mxu1 }
 0x83b   : > { %v5421_v57 = vadd.f32 %v2790_v55, %v2650_v48 }
 0x83c   : > { %v2796_v60 = vmul.f32 %v5419_v54, %v5419_v54 }
 0x83d   : > { %v2797_v15 = vmul.f32 %v5421_v57, %v5421_v57 }
 0x83e   : > { %v2802_v62 = vmul.f32 %v2796_v60, %v5419_v54 }
 0x83f   : > { %v2803_v26 = vmul.f32 %v2797_v15, %v5421_v57  ;;  %v2762_v63 = vpop.f32.mrf.mxu3 }
 0x840   : > { %v2808_v1 = vmul.f32 0.044715, %v2802_v62  ;;  %v5431_v2 = vadd.f32 %v2762_v63, %v2648_v13 }
 0x841   : > { %v2809_v3 = vmul.f32 0.044715, %v2803_v26  ;;  %v2778_v4 = vpop.f32.mrf.mxu0 }
 0x842   : > { %v2814_v5 = vadd.f32 %v2808_v1, %v5419_v54  ;;  %v2795_v6 = vmul.f32 %v5431_v2, %v5431_v2  ;;  %v2779_v21 = vadd.f32 %v2778_v4, %v2649_v47  ;;  %v2792_v7 = vpop.f32.mrf.mxu1 }
 0x843   : > { %v2815_v8 = vadd.f32 %v2809_v3, %v5421_v57  ;;  %v2793_v9 = vadd.f32 %v2792_v7, %v2650_v48 }
 0x844   : > { %v2820_v10 = vmul.f32 0.7978846, %v2814_v5  ;;  %v2801_v56 = vmul.f32 %v2795_v6, %v5431_v2  ;;  %v2799_v11 = vmul.f32 %v2779_v21, %v2779_v21 }
 0x845   : > { %v2821_v12 = vmul.f32 0.7978846, %v2815_v8  ;;  %v2800_v23 = vmul.f32 %v2793_v9, %v2793_v9 }
 0x846   : > { %v2807_v14 = vmul.f32 0.044715, %v2801_v56  ;;  %v2805_v17 = vmul.f32 %v2799_v11, %v2779_v21  ;;  %4547 = vtanh.f32 %v2820_v10 }
 0x847   : > { %v2806_v19 = vmul.f32 %v2800_v23, %v2793_v9  ;;  %v2764_v20 = vpop.f32.mrf.mxu3  ;;  %4549 = vtanh.f32 %v2821_v12 }
 0x848   : > { %v2813_v22 = vadd.f32 %v2807_v14, %v5431_v2  ;;  %v2811_v24 = vmul.f32 0.044715, %v2805_v17  ;;  %v2765_v18 = vadd.f32 %v2764_v20, %v2648_v13 }
 0x849   : > { %v2812_v27 = vmul.f32 0.044715, %v2806_v19 }
 0x84a   : > { %v2819_v28 = vmul.f32 0.7978846, %v2813_v22  ;;  %v2817_v29 = vadd.f32 %v2811_v24, %v2779_v21  ;;  %v2798_v61 = vmul.f32 %v2765_v18, %v2765_v18 }
 0x84b   : > { %v2818_v30 = vadd.f32 %v2812_v27, %v2793_v9 }
 0x84c   : > { %v2823_v31 = vmul.f32 0.7978846, %v2817_v29  ;;  %v2804_v32 = vmul.f32 %v2798_v61, %v2765_v18  ;;  %4551 = vtanh.f32 %v2819_v28  ;;  %v4548_v34 = vpop.eup %4547 }
 0x84d   : > { %v2824_v33 = vmul.f32 0.7978846, %v2818_v30  ;;  %v4550_v16 = vpop.eup %4549  ;;  %v2832_v25 = vadd.f32 1.0, %v4548_v34 }
 0x84e   : > { %4553 = vtanh.f32 %v2823_v31  ;;  %v2810_v35 = vmul.f32 0.044715, %v2804_v32  ;;  %v2833_v37 = vadd.f32 1.0, %v4550_v16 }
 0x84f   : > { %4555 = vtanh.f32 %v2824_v33  ;;  %v2838_v42 = vmul.f32 0.5, %v2832_v25 }
 0x850   : > { %v2816_v36 = vadd.f32 %v2810_v35, %v2765_v18  ;;  %v2839_v44 = vmul.f32 0.5, %v2833_v37 }
 0x851   : > { %v2844_v49 = vmul.f32 %v2838_v42, %v5419_v54 }
 0x852   : > { %v2822_v38 = vmul.f32 0.7978846, %v2816_v36  ;;  %v4552_v39 = vpop.eup %4551  ;;  %v2845_v52 = vmul.f32 %v2839_v44, %v5421_v57  ;;  %v4504_v57 = vld [vmem:[%s914_s19] ss:$0 sm:$0xff] }
 0x853   : > { %v2831_v46 = vadd.f32 1.0, %v4552_v39 }
 0x854   : > { %v4554_v40 = vpop.eup %4553  ;;  %4557 = vtanh.f32 %v2822_v38 }
 0x855   : > { %v4556_v41 = vpop.eup %4555  ;;  %v2835_v43 = vadd.f32 1.0, %v4554_v40  ;;  %v2837_v59 = vmul.f32 0.5, %v2831_v46 }
 0x856   : > { %v2836_v45 = vadd.f32 1.0, %v4556_v41 }
 0x857   : > { %v2841_v47 = vmul.f32 0.5, %v2835_v43  ;;  %v2843_v26 = vmul.f32 %v2837_v59, %v5431_v2 }
 0x858   : > { %v2842_v48 = vmul.f32 0.5, %v2836_v45 }
 0x859   : > { %v2847_v50 = vmul.f32 %v2841_v47, %v2779_v21 }
 0x85a   : > { %v4558_v51 = vpop.eup %4557  ;;  %v2848_v55 = vmul.f32 %v2842_v48, %v2793_v9 }
 0x85b   : > { %v2834_v60 = vadd.f32 1.0, %v4558_v51  ;;  %v2898_v13 = vpack.c.bf16 %v2847_v50, %v2844_v49 }
 0x85c   : > { %v2899_v15 = vpack.c.bf16 %v2848_v55, %v2845_v52 }
 0x85d   : > { %v2840_v62 = vmul.f32 0.5, %v2834_v60  ;;  %3066 = vmatmul.bf16.vlgmr.msra.gmra.mxu3 %v2898_v13 }
 0x85e   : > { %3080 = vmatmul.bf16.vlgmr.msrb.gmra.mxu0 %v2899_v15 }
 0x85f   : > { %v2846_v63 = vmul.f32 %v2840_v62, %v2765_v18 }
 0x861   : > { %v2897_v0 = vpack.c.bf16 %v2846_v63, %v2843_v26 }
 0x863   : > { %3052 = vmatmul.bf16.vlgmr.msrb.gmra.mxu2 %v2897_v0 }
 0x8db   : > { %v3081_v54 = vpop.f32.mrf.mxu0 }
 0x8e0   : > { %v3067_v1 = vpop.f32.mrf.mxu3 }
 0x8e3   : > { %v3083_v9 = vpop.f32.mrf.mxu0 }
 0x8e6   : > { %v3053_v3 = vpop.f32.mrf.mxu2 }
 0x8e7   : > { %v3068_v4 = vadd.f32 %v3067_v1, %v3053_v3 }
 0x8e8   : > { %v3069_v7 = vpop.f32.mrf.mxu3 }
 0x8e9   : > { %v3082_v5 = vadd.f32 %v3081_v54, %v3068_v4 }
 0x8eb   : > { %v3086_v6 = vadd.f32 %v3082_v5, %v5328_v53 }
 0x8ed   : > { %v3092_v21 = vadd.f32 %v4504_v57, %v3086_v6 }
 0x8ee   : > { %v3055_v8 = vpop.f32.mrf.mxu2 }
 0x8ef   : > { %3094 = vst.msk [vmem:[#allocation2] sm:$0xff] %vm1713_vm7, %v3092_v21  ;;  %v3070_v2 = vadd.f32 %v3069_v7, %v3055_v8 }
 0x8f1   : > { %v3084_v10 = vadd.f32 %v3083_v9, %v3070_v2 }
 0x8f3   : > { %v3087_v56 = vadd.f32 %v3084_v10, %v5333_v58  ;;  %3099 = sbr.rel (%p4170_p5) target bundleno = 2968 (0xb98), region = 124 }
 0x8f5   : > { %v3093_v11 = vadd.f32 %v4504_v57, %v3087_v56 }
 0x8f7   : > { %3095 = vst.msk [vmem:[#allocation2 + $0x8] sm:$0x3] %vm1717_vm8, %v3093_v11 }
 0x8f8   : > { %v4421_v53 = vld [vmem:[%s5583_s13 + $0x28] sm:$0xff]  ;;  %v3101_v12 = vrot.slane %v3092_v21, 4  ;;  %vm3103_vm2 = vcmask 1040384   ;;  %v4420_v23 = vld [vmem:[%s5583_s13 + $0x20] sm:$0xff]  ;;  %v4419_v58 = vld [vmem:[%s5583_s13 + $0x18] sm:$0xff]  ;;  %v4655_v36 = vmov 0  }
 0x8f9   : > { %3164 = vmatpush.bf16.msra.mxu0 %v4421_v53  ;;  %v4418_v17 = vld [vmem:[%s5583_s13 + $0x10] sm:$0xff]  ;;  %v4417_v19 = vld [vmem:[%s5583_s13 + $0x8] sm:$0xff]  ;;  %v4416_v20 = vld [vmem:[%s5583_s13] sm:$0xff]  ;;  %4559 = vset.pattern.permute.xlu0 %v4655_v36  ;;  %vm3384_vm3 = vcmask 523264   ;;  %vm3401_vm4 = vcmask 9216  }
 0x8fa   : > { %v3104_v14 = vsel %vm3103_vm2, %v3092_v21, %v3101_v12  ;;  %v4427_v24 = vld [vmem:[%s5587_s17 + $0x28] sm:$0xff]  ;;  %v4426_v18 = vld [vmem:[%s5587_s17 + $0x20] sm:$0xff]  ;;  %v4425_v27 = vld [vmem:[%s5587_s17 + $0x18] sm:$0xff] }
 0x8fb   : > { %3105 = vst.msk [vmem:[#allocation6] sm:$0x3] %vm1717_vm8, %v3104_v14  ;;  %v3118_v22 = vpack.c.bf16 %v3104_v14, %v3104_v14  ;;  %3249 = vmatpush.bf16.msra.mxu1 %v4427_v24  ;;  %v4424_v28 = vld [vmem:[%s5587_s17 + $0x10] sm:$0xff]  ;;  %v4423_v29 = vld [vmem:[%s5587_s17 + $0x8] sm:$0xff]  ;;  %v4422_v61 = vld [vmem:[%s5587_s17] sm:$0xff]  ;;  %vm3180_vm8 = vcmask 517120  }
 0x8fc   : > { %v4560_v30 = vld [vmem:[%s5637_s7] ss:$0 sm:$0xff]  ;;  %v4435_v25 = vld [vmem:[%s5639_s24 + $0x38] sm:$0xff]  ;;  %v4434_v37 = vld [vmem:[%s5639_s24 + $0x30] sm:$0xff] }
 0x8fd   : > { %3165 = vmatpush.bf16.msra.mxu0 %v4420_v23  ;;  %v4561_v31 = vld [vmem:[%s5638_s1] ss:$0 sm:$0xff]  ;;  %3334 = vmatpush.bf16.msra.mxu2 %v4435_v25  ;;  %v4433_v38 = vld [vmem:[%s5639_s24 + $0x28] sm:$0xff]  ;;  %v4431_v40 = vld [vmem:[%s5639_s24 + $0x18] sm:$0xff] }
 0x8fe   : > { %v4432_v39 = vld [vmem:[%s5639_s24 + $0x20] sm:$0xff]  ;;  %v4430_v41 = vld [vmem:[%s5639_s24 + $0x10] sm:$0xff]  ;;  %v4429_v47 = vld [vmem:[%s5639_s24 + $0x8] sm:$0xff] }
 0x8ff   : > { %3250 = vmatpush.bf16.msra.mxu1 %v4426_v18  ;;  %v4562_v42 = vld [vmem:[#allocation3] ss:$0 sm:$0xff]  ;;  %v4428_v48 = vld [vmem:[%s5639_s24] sm:$0xff]  ;;  %v4439_v49 = vld [vmem:[%s5641_s22 + $0x18] sm:$0xff] }
 0x900   : > { %3392 = vmatpush.bf16.msra.mxu3 %v4439_v49  ;;  %v4438_v50 = vld [vmem:[%s5641_s22 + $0x10] sm:$0xff]  ;;  %v4437_v51 = vld [vmem:[%s5641_s22 + $0x8] sm:$0xff]  ;;  %v4563_v52 = vld [vmem:[%s5642_s6] ss:$0 sm:$0xff] }
 0x901   : > { %3166 = vmatpush.bf16.msra.mxu0 %v4419_v58  ;;  %3335 = vmatpush.bf16.msra.mxu2 %v4434_v37  ;;  %v4564_v60 = vld [vmem:[%s5643_s21] ss:$0 sm:$0xff] }
 0x902   : > { %v4436_v26 = vld [vmem:[%s5641_s22] sm:$0xff] }
 0x903   : > { %3251 = vmatpush.bf16.msra.mxu1 %v4425_v27  ;;  %v4565_v63 = vld [vmem:[%s5644_s20] ss:$0 sm:$0xff] }
 0x904   : > { %3393 = vmatpush.bf16.msra.mxu3 %v4438_v50  ;;  %v4566_v4 = vld [vmem:[%s5645_s30] ss:$0 sm:$0xff] }
 0x905   : > { %3167 = vmatpush.bf16.msra.mxu0 %v4418_v17  ;;  %3336 = vmatpush.bf16.msra.mxu2 %v4433_v38 }
 0x907   : > { %3252 = vmatpush.bf16.msra.mxu1 %v4424_v28 }
 0x908   : > { %3394 = vmatpush.bf16.msra.mxu3 %v4437_v51 }
 0x909   : > { %3168 = vmatpush.bf16.msra.mxu0 %v4417_v19  ;;  %3337 = vmatpush.bf16.msra.mxu2 %v4432_v39 }
 0x90b   : > { %3253 = vmatpush.bf16.msra.mxu1 %v4423_v29 }
 0x90c   : > { %3395 = vmatpush.bf16.msra.mxu3 %v4436_v26 }
 0x90d   : > { %3169 = vmatpush.bf16.msra.mxu0 %v4416_v20  ;;  %3338 = vmatpush.bf16.msra.mxu2 %v4431_v40 }
 0x90f   : > { %3254 = vmatpush.bf16.msra.mxu1 %v4422_v61 }
 0x910   : > { %4195 = vmatmul.msk.bf16.vlgmr.msra.gmra.mxu0 %vm1713_vm7, %v3118_v22 }
 0x911   : > { %3339 = vmatpush.bf16.msra.mxu2 %v4430_v41 }
 0x912   : > { %4220 = vmatmul.msk.bf16.vlgmr.msra.gmra.mxu1 %vm1713_vm7, %v3118_v22  ;;  %vm3403_vm7 = vcmask 1024  }
 0x915   : > { %3340 = vmatpush.bf16.msra.mxu2 %v4429_v47 }
 0x919   : > { %3341 = vmatpush.bf16.msra.mxu2 %v4428_v48 }
 0x98d   : > { %v3171_v32 = vpop.f32.mrf.mxu0 }
 0x98e   : > { %v3172_v33 = vadd.f32 %v4560_v30, %v3171_v32 }
 0x98f   : > { %v3256_v45 = vpop.f32.mrf.mxu1 }
 0x990   : > { %v3179_v34 = vmul.f32 %v4561_v31, %v3172_v33 }
 0x992   : > { %v3181_v35 = vsel %vm3180_vm8, %v3179_v34, 0.0 }
 0x993   : > { %3182 = vadd.xlane.f32.xlu0 %v3181_v35 }
 0x995   : > { %v3173_v16 = vpop.f32.mrf.mxu0 }
 0x997   : > { %v3258_v46 = vpop.f32.mrf.mxu1 }
 0xa06   : > { %v3183_v43 = vpop.xlane.xlu0 %3182 }
 0xa07   : > { %v3188_v44 = vadd.f32 %v4562_v42, %v3183_v43 }
 0xa09   : > { %3404 = vst.msk [vmem:[%s5640_s15] sm:$0x3] %vm3403_vm7, %v3188_v44  ;;  %3204 = vperm.xlu0 %4559, %v3188_v44  }
 0xa7b   : > { %v3205_v55 = vpop.permute.xlu0 %3204 }
 0xa7c   : > { %v3210_v59 = vmul.f32 %v4563_v52, %v3205_v55 }
 0xa7e   : > { %v3257_v13 = vadd.f32 %v3256_v45, %v3210_v59 }
 0xa80   : > { %v3264_v15 = vadd.f32 %v4564_v60, %v3257_v13 }
 0xa82   : > { %v3281_v62 = vpack.c.bf16 %v3264_v15, %v3264_v15 }
 0xa84   : > { %3342 = vmatmul.bf16.vlgmr.msra.gmra.mxu2 %v3281_v62 }
 0xb07   : > { %v3343_v0 = vpop.f32.mrf.mxu2 }
 0xb08   : > { %v3344_v1 = vadd.f32 %v4565_v63, %v3343_v0 }
 0xb0a   : > { %v3355_v54 = vpack.c.bf16 %v3344_v1, %v3344_v1 }
 0xb0c   : > { %4269 = vmatmul.msk.bf16.vlgmr.msra.gmra.mxu3 %vm3384_vm3, %v3355_v54 }
 0xb0f   : > { %v3345_v3 = vpop.f32.mrf.mxu2 }
 0xb8f   : > { %v3397_v5 = vpop.f32.mrf.mxu3 }
 0xb90   : > { %v3398_v57 = vadd.f32 %v4566_v4, %v3397_v5 }
 0xb92   : > { %3402 = vst.msk [vmem:[#allocation4] sm:$0x3] %vm3401_vm4, %v3398_v57 }
 0xb97   : > { %v3399_v6 = vpop.f32.mrf.mxu3 }
 0xb98 PF: > { %p4452_p6 = scmp.eq.s32.totalorder %s4802_s28, 1  ;;  %s4656_s16 = smov [#allocation4]  }
 0xb99   : > { %s3411_s10 = sshll.u32 %s4656_s16, 4  ;;  %s5646_s1 = sld [smem:[#allocation30_spill]]  ;;  %s3412_s10 = int_to_ptr.vmem [resolvable:$true] %s3411_s10 }
 0xb9a   : > { %s5647_s9 = sld [smem:[#allocation32_spill]]  ;;  %s4657_s6 = smov [#allocation6]  }
 0xb9b   : > { %s3426_s26 = sshll.u32 %s4657_s6, 4  ;;  %s3427_s26 = int_to_ptr.vmem [resolvable:$true] %s3426_s26 }
 0xb9f   : > { %s3413_s2 = sshll.u32 %s5646_s1, 4  ;;  %s3414_s2 = int_to_ptr.hbm [resolvable:$true] %s3413_s2 }
 0xba0   : > { %4445 = dma.vmem_to_hbm [thread:$0]  (%p4452_p6), %s3412_s10, 32, %s3414_s2, [#allocation5]  }
 0xba1   : > { %s3428_s5 = sshll.u32 %s5647_s9, 4  ;;  %s3429_s5 = int_to_ptr.hbm [resolvable:$true] %s3428_s5 }
 0xba2   : > { %4447 = dma.vmem_to_hbm [thread:$0]  (%p4452_p6), %s3427_s26, 32, %s3429_s5, [#allocation7]  }
 0xba3   : > { %4628 = dma.done.wait (%p4452_p6), [#allocation5], 32  }
 0xba4   : > { %4630 = vsyncadd (%p4452_p6), [#allocation5], 4294967264 }
 0xba5   : > { %4632 = dma.done.wait (%p4452_p6), [#allocation7], 32  }
 0xba6   : > { %4634 = vsyncadd (%p4452_p6), [#allocation7], 4294967264 }
 0xba7 PF: > { %s5648_s3 = sld [smem:[#allocation10_spill]] }
 0xbad   : > { %s41_s7 = sadd.s32 1, %s5648_s3  }
 0xbae   : > { %p38_p7 = scmp.ge.s32.totalorder %s41_s7, 4  }
 0xbb0   :  { %40 = sbr.rel (!%p38_p7) target bundleno = 25 (0x19), region = 194 }
 0xbb5   :  { %3450 = vsyncpa [#allocation5], 1 }
 0xbb6   :  { %3452 = vsyncpa [#allocation5 + $0x1], 1 }
 0xbb7   :  { %3453 = vsyncpa [#allocation7], 1 }

</bundles_post_ra>
